<compile_context>
chip_gen: v5e
topology: v5e:2x2
jax: 0.10.0
libtpu: 0.0.40
codegen_flags: <defaults>
</compile_context>

<pallas_src>
import functools

import jax
import jax.numpy as jnp
from jax import lax
from jax.experimental import pallas as pl
from jax.experimental.pallas import tpu as pltpu

# Full-precision XLA matmuls so the pure-JAX references match the f32 kernel.
jax.config.update("jax_default_matmul_precision", "highest")


# ---------------------------------------------------------------------------
# Dense packed weight slab: (80, 128) f32, pieces co-located in lane bands.
# name -> (row0, col0, n_rows, n_cols).  Piece rows are 8-aligned.
# ---------------------------------------------------------------------------
_SLAB_ROWS = 80
_SLAB_COLS = 128

_LAYOUT = {
    "e1":  (0,   0,  73, 34),   # full eval layer-1 weight (batched path)
    "e1e": (0,  34,  36, 34),   # even rows of e1 (single-board path)
    "e1o": (40, 34,  36, 34),   # odd rows of e1
    "e2":  (0,  68,  34, 34),
    "b1":  (40, 68,   1, 16),
    "b2":  (40, 84,   1, 16),
    "b3":  (40, 100,  1,  2),
    "eb1": (48, 68,   1, 34),
    "eb2": (56, 68,   1, 34),
    "eb3": (64, 68,   1,  1),
    "w1":  (0, 102,  54, 16),
    "w2":  (56, 102, 16, 16),
    "w3":  (56, 118, 16,  2),
    "e3":  (0, 118,  34,  1),
    "e1l": (72,  0,   1, 34),   # alias: last row of e1 (not written separately)
}

# Sanity: no overlapping pieces in the manual layout (aliases excluded).
_occ = set()
for _name, (_r, _c, _nr, _nc) in _LAYOUT.items():
    if _name == "e1l":
        continue
    assert _r + _nr <= _SLAB_ROWS and _c + _nc <= _SLAB_COLS, _name
    for _rr in range(_r, _r + _nr):
        for _cc in range(_c, _c + _nc):
            assert (_rr, _cc) not in _occ, ("overlap", _name, _rr, _cc)
            _occ.add((_rr, _cc))
del _occ


def pack_params(params):
    """Pack all weights/biases (stored as x @ W + b, i.e. (in,out)) into one
    dense (80,128) f32 slab.  Runs ONCE at parameter-load time."""
    (w1, b1, w2, b2, w3, b3, e1, eb1, e2, eb2, e3, eb3) = [
        jnp.asarray(p, jnp.float32) for p in params]
    pieces = {
        "w1": w1, "b1": b1.reshape(1, -1),
        "w2": w2, "b2": b2.reshape(1, -1),
        "w3": w3, "b3": b3.reshape(1, -1),
        "e1": e1, "e1e": e1[0:72:2, :], "e1o": e1[1:72:2, :],
        "eb1": eb1.reshape(1, -1),
        "e2": e2, "eb2": eb2.reshape(1, -1),
        "e3": e3, "eb3": eb3.reshape(1, -1),
    }
    slab = jnp.zeros((_SLAB_ROWS, _SLAB_COLS), jnp.float32)
    for name, arr in pieces.items():
        r0, c0, nr, nc = _LAYOUT[name]
        assert arr.shape == (nr, nc), (name, arr.shape, (nr, nc))
        slab = slab.at[r0:r0 + nr, c0:c0 + nc].set(arr)
    return slab


# ---------------------------------------------------------------------------
# Kernel bodies (shared helpers).
# ---------------------------------------------------------------------------
def _piece(slab_ref, name):
    r0, c0, nr, nc = _LAYOUT[name]
    return slab_ref[r0:r0 + nr, c0:c0 + nc]     # static slice of the one slab


def _clamp(t):
    return jnp.clip(t, -1.0, 1.0)


def _sight(win, slab_ref):
    """sightStack applied to a stack of 54-feature rows (rows = patches)."""
    h = _clamp(jnp.dot(win, _piece(slab_ref, "w1"),
                       preferred_element_type=jnp.float32) + _piece(slab_ref, "b1"))
    h = _clamp(jnp.dot(h, _piece(slab_ref, "w2"),
                       preferred_element_type=jnp.float32) + _piece(slab_ref, "b2"))
    return _clamp(jnp.dot(h, _piece(slab_ref, "w3"),
                          preferred_element_type=jnp.float32) + _piece(slab_ref, "b3"))


def lila_single_kernel(win_ref, extra_ref, slab_ref, out_ref):
    """Single-board fused kernel (module-exact latency path)."""
    s = _sight(win_ref[...], slab_ref)                       # (36, 2)
    # vision @ E1 == s[:,0]^T @ E1_even + s[:,1]^T @ E1_odd + extra * E1_last
    dn = (((0,), (0,)), ((), ()))
    v = lax.dot_general(s[:, 0:1], _piece(slab_ref, "e1e"), dn,
                        preferred_element_type=jnp.float32)
    v = v + lax.dot_general(s[:, 1:2], _piece(slab_ref, "e1o"), dn,
                            preferred_element_type=jnp.float32)   # (1, 34)
    v = _clamp(v + extra_ref[0] * _piece(slab_ref, "e1l") + _piece(slab_ref, "eb1"))
    v = _clamp(jnp.dot(v, _piece(slab_ref, "e2"),
                       preferred_element_type=jnp.float32) + _piece(slab_ref, "eb2"))
    out_ref[...] = _clamp(jnp.dot(v, _piece(slab_ref, "e3"),
                                  preferred_element_type=jnp.float32)
                          + _piece(slab_ref, "eb3"))


def sight_kernel(win_ref, slab_ref, s_ref):
    """Batched sight stack over a (B_tile*36, 54) block."""
    s_ref[...] = _sight(win_ref[...], slab_ref)


def eval_kernel(vis_ref, slab_ref, out_ref):
    """Batched evaluation stack over a (B_tile, 73) block."""
    v = _clamp(jnp.dot(vis_ref[...], _piece(slab_ref, "e1"),
                       preferred_element_type=jnp.float32) + _piece(slab_ref, "eb1"))
    v = _clamp(jnp.dot(v, _piece(slab_ref, "e2"),
                       preferred_element_type=jnp.float32) + _piece(slab_ref, "eb2"))
    out_ref[...] = _clamp(jnp.dot(v, _piece(slab_ref, "e3"),
                                  preferred_element_type=jnp.float32)
                          + _piece(slab_ref, "eb3"))


# Advisory cost estimate so XLA can overlap the tiny single-board call.
_MACS_SINGLE = (36 * 54 * 16 + 36 * 16 * 16 + 36 * 16 * 2
                + 73 * 34 + 34 * 34 + 34)
_COST_SINGLE = pl.CostEstimate(
    flops=2 * _MACS_SINGLE,
    transcendentals=0,
    bytes_accessed=36 * 54 * 4 + _SLAB_ROWS * _SLAB_COLS * 4 + 4 + 4,
)


# ---------------------------------------------------------------------------
# Window construction (wrapper side, XLA): 9 static strided slices, no gather.
# ---------------------------------------------------------------------------
def _build_windows(board3):
    """board3: (..., 8, 8, 6) -> (..., 36, 54); window row i has (x,y)=(i//6,i%6),
    column block k = ox*3+oy holds board[x+ox, y+oy, :] (reference concat order)."""
    lead = board3.shape[:-3]
    return jnp.concatenate(
        [board3[..., ox:ox + 6, oy:oy + 6, :].reshape(*lead, 36, 6)
         for ox in range(3) for oy in range(3)],
        axis=-1)


# ---------------------------------------------------------------------------
# Single-board wrapper (matches LilaModel.forward exactly: (385,) -> (1,)).
# ---------------------------------------------------------------------------
@jax.jit
def lila_forward(inp, slab):
    inp = inp.reshape(385).astype(jnp.float32)
    windows = _build_windows(inp[:384].reshape(8, 8, 6))        # (36, 54)
    extra = inp[384:385]                                        # (1,) SMEM scalar
    out = pl.pallas_call(
        lila_single_kernel,
        out_shape=jax.ShapeDtypeStruct((1, 1), jnp.float32),
        in_specs=[
            pl.BlockSpec(memory_space=pltpu.MemorySpace.VMEM),   # windows
            pl.BlockSpec(memory_space=pltpu.MemorySpace.SMEM),   # extra scalar
            pl.BlockSpec(memory_space=pltpu.MemorySpace.VMEM),   # packed weights
        ],
        out_specs=pl.BlockSpec(memory_space=pltpu.MemorySpace.VMEM),
        cost_estimate=_COST_SINGLE,
    )(windows, extra, slab)
    return out.reshape(1)


# ---------------------------------------------------------------------------
# Batched wrapper (throughput path): boards (B, 385) -> (B, 1).
# ---------------------------------------------------------------------------
@functools.partial(jax.jit, static_argnames=("block_boards",))
def lila_forward_batch(boards, slab, block_boards=256):
    B = boards.shape[0]
    boards = boards.reshape(B, 385).astype(jnp.float32)
    bt = min(block_boards, B)                       # boards per grid step
    grid = (pl.cdiv(B, bt),)
    # bt=256: windows + sight-out blocks ~19 MB VMEM (double-buffered, 128-lane
    # padded) -> fits the 32 MiB scoped default on v5e/v6e/v7x.
    mcp = pltpu.CompilerParams(dimension_semantics=("parallel",))
    slab_spec = pl.BlockSpec((_SLAB_ROWS, _SLAB_COLS), lambda i: (0, 0))  # resident

    windows = _build_windows(boards[:, :384].reshape(B, 8, 8, 6)).reshape(B * 36, 54)

    # Stage 1: sight stack on all B*36 patches (big MXU matmuls).
    s2d = pl.pallas_call(
        sight_kernel,
        out_shape=jax.ShapeDtypeStruct((B * 36, 2), jnp.float32),
        grid_spec=pltpu.PrefetchScalarGridSpec(
            num_scalar_prefetch=0, grid=grid,
            in_specs=[pl.BlockSpec((bt * 36, 54), lambda i: (i, 0)),
                      slab_spec],
            out_specs=pl.BlockSpec((bt * 36, 2), lambda i: (i, 0))),
        compiler_params=mcp,
    )(windows, slab)

    # Interleave per board (vision[2i], vision[2i+1]) and fold in the extra
    # scalar as column 72 -> one (B, 73) operand for the eval stage.
    vision = jnp.concatenate([s2d.reshape(B, 72), boards[:, 384:385]], axis=1)

    # Stage 2: evaluation stack, batched over boards.
    out = pl.pallas_call(
        eval_kernel,
        out_shape=jax.ShapeDtypeStruct((B, 1), jnp.float32),
        grid_spec=pltpu.PrefetchScalarGridSpec(
            num_scalar_prefetch=0, grid=grid,
            in_specs=[pl.BlockSpec((bt, 73), lambda i: (i, 0)),
                      slab_spec],
            out_specs=pl.BlockSpec((bt, 1), lambda i: (i, 0))),
        compiler_params=mcp,
    )(vision, slab)
    return out                                      # (B, 1)


# ---------------------------------------------------------------------------
# Deterministic parameter init (stored as (in, out): x @ W + b == PyTorch x @ W.T + b).
# ---------------------------------------------------------------------------
def init_params(key):
    def linear(key, fan_in, fan_out):
        kw, kb = jax.random.split(key)
        bound = 1.0 / jnp.sqrt(fan_in)
        w = jax.random.uniform(kw, (fan_in, fan_out), jnp.float32, -bound, bound)
        b = jax.random.uniform(kb, (fan_out,), jnp.float32, -bound, bound)
        return w, b

    keys = jax.random.split(key, 6)
    w1, b1 = linear(keys[0], 54, 16)
    w2, b2 = linear(keys[1], 16, 16)
    w3, b3 = linear(keys[2], 16, 2)
    e1, eb1 = linear(keys[3], 73, 34)
    e2, eb2 = linear(keys[4], 34, 34)
    e3, eb3 = linear(keys[5], 34, 1)
    return (w1, b1, w2, b2, w3, b3, e1, eb1, e2, eb2, e3, eb3)


# ---------------------------------------------------------------------------
# Pure-JAX references for correctness checks.
# ---------------------------------------------------------------------------
def lila_reference(inp, params):
    """Mirrors the PyTorch forward loop exactly (one board)."""
    (w1, b1, w2, b2, w3, b3, e1, eb1, e2, eb2, e3, eb3) = params
    inp = inp.reshape(385).astype(jnp.float32)
    clamp = lambda t: jnp.clip(t, -1.0, 1.0)

    vision = jnp.zeros(73, dtype=jnp.float32)
    for i in range(36):
        x, y = i // 6, i % 6
        parts = []
        for ox in range(3):
            for oy in range(3):
                base = (x + ox) * 8 * 6 + (y + oy) * 6
                parts.append(inp[base:base + 6])
        sq = jnp.concatenate(parts)
        h = clamp(sq @ w1 + b1)
        h = clamp(h @ w2 + b2)
        s = clamp(h @ w3 + b3)
        vision = vision.at[2 * i].set(s[0]).at[2 * i + 1].set(s[1])
    vision = vision.at[72].set(inp[384])

    v = clamp(vision @ e1 + eb1)
    v = clamp(v @ e2 + eb2)
    v = clamp(v @ e3 + eb3)
    return v  # shape (1,)


def lila_reference_batch(boards, params):
    """Vectorised reference for a batch of boards (XLA only, no Pallas)."""
    (w1, b1, w2, b2, w3, b3, e1, eb1, e2, eb2, e3, eb3) = params
    B = boards.shape[0]
    boards = boards.reshape(B, 385).astype(jnp.float32)
    clamp = lambda t: jnp.clip(t, -1.0, 1.0)
    windows = _build_windows(boards[:, :384].reshape(B, 8, 8, 6))   # (B, 36, 54)
    h = clamp(windows @ w1 + b1)
    h = clamp(h @ w2 + b2)
    s = clamp(h @ w3 + b3)                                          # (B, 36, 2)
    vision = jnp.concatenate([s.reshape(B, 72), boards[:, 384:385]], axis=1)
    v = clamp(vision @ e1 + eb1)
    v = clamp(v @ e2 + eb2)
    v = clamp(v @ e3 + eb3)
    return v  # (B, 1)


if __name__ == "__main__":
    key = jax.random.PRNGKey(0)
    k_inp, k_par = jax.random.split(key)

    params = init_params(k_par)
    slab = jax.block_until_ready(pack_params(params))   # once, at load time

    # --- single-board path (module-exact) ---
    inp = jax.random.uniform(k_inp, (385,), jnp.float32, -1.0, 1.0)
    out1 = jax.block_until_ready(lila_forward(inp, slab))
    ref1 = lila_reference(inp, params)
    assert out1.shape == (1,), out1.shape
    assert jnp.allclose(out1, ref1, atol=1e-5, rtol=1e-5), (out1, ref1)

    # --- batched path (small shapes, 3 grid steps of 32 boards) ---
    B = 96
    boards = jax.random.uniform(k_inp, (B, 385), jnp.float32, -1.0, 1.0)
    outB = jax.block_until_ready(lila_forward_batch(boards, slab, block_boards=32))
    refB = lila_reference_batch(boards, params)
    assert outB.shape == (B, 1), outB.shape
    assert jnp.allclose(outB, refB, atol=1e-5, rtol=1e-5), (outB, refB)

    # Spot-check the batched path against the exact per-board loop reference.
    for b in range(2):
        ref_b = lila_reference(boards[b], params)
        assert jnp.allclose(outB[b], ref_b, atol=1e-5, rtol=1e-5), (b, outB[b], ref_b)

    print("KERNEL_OK")
</pallas_src>

<mosaic_0001>
module attributes {stable_mosaic.version = 11 : i64} {
  func.func @lila_single_kernel(%arg0: memref<36x54xf32, #tpu.memory_space<vmem>>, %arg1: memref<1xf32, #tpu.memory_space<smem>>, %arg2: memref<80x128xf32, #tpu.memory_space<vmem>>, %arg3: memref<1x1xf32, #tpu.memory_space<vmem>>) attributes {dimension_semantics = [], scalar_prefetch = 0 : i64, scratch_operands = 0 : i64, tpu.core_type = #tpu.core_type<tc>} {
    %c0 = arith.constant 0 : index
    %c0_0 = arith.constant 0 : index
    %0 = vector.load %arg0[%c0, %c0_0] : memref<36x54xf32, #tpu.memory_space<vmem>>, vector<36x54xf32>
    %c0_1 = arith.constant 0 : index
    %c102 = arith.constant 102 : index
    %1 = vector.load %arg2[%c0_1, %c102] : memref<80x128xf32, #tpu.memory_space<vmem>>, vector<54x16xf32>
    %cst = arith.constant dense<0.000000e+00> : vector<36x16xf32>
    %2 = tpu.matmul %0, %1, %cst {dimension_numbers = #tpu.dot_dimension_numbers<[1], [0], [0], [1], [0, 0, 1, 1], [], []>, precision = #tpu.contract_precision<fp32>} : vector<36x54xf32>, vector<54x16xf32>, vector<36x16xf32> -> vector<36x16xf32>
    %c40 = arith.constant 40 : index
    %c68 = arith.constant 68 : index
    %3 = vector.load %arg2[%c40, %c68] : memref<80x128xf32, #tpu.memory_space<vmem>>, vector<1x16xf32>
    %4 = vector.broadcast %3 : vector<1x16xf32> to vector<36x16xf32>
    %5 = arith.addf %2, %4 : vector<36x16xf32>
    %cst_2 = arith.constant -1.000000e+00 : f32
    %cst_3 = arith.constant 1.000000e+00 : f32
    %6 = vector.broadcast %cst_2 : f32 to vector<36x16xf32>
    %7 = arith.maximumf %6, %5 : vector<36x16xf32>
    %8 = vector.broadcast %cst_3 : f32 to vector<36x16xf32>
    %9 = arith.minimumf %8, %7 : vector<36x16xf32>
    %c56 = arith.constant 56 : index
    %c102_4 = arith.constant 102 : index
    %10 = vector.load %arg2[%c56, %c102_4] : memref<80x128xf32, #tpu.memory_space<vmem>>, vector<16x16xf32>
    %cst_5 = arith.constant dense<0.000000e+00> : vector<36x16xf32>
    %11 = tpu.matmul %9, %10, %cst_5 {dimension_numbers = #tpu.dot_dimension_numbers<[1], [0], [0], [1], [0, 0, 1, 1], [], []>, precision = #tpu.contract_precision<fp32>} : vector<36x16xf32>, vector<16x16xf32>, vector<36x16xf32> -> vector<36x16xf32>
    %c40_6 = arith.constant 40 : index
    %c84 = arith.constant 84 : index
    %12 = vector.load %arg2[%c40_6, %c84] : memref<80x128xf32, #tpu.memory_space<vmem>>, vector<1x16xf32>
    %13 = vector.broadcast %12 : vector<1x16xf32> to vector<36x16xf32>
    %14 = arith.addf %11, %13 : vector<36x16xf32>
    %cst_7 = arith.constant -1.000000e+00 : f32
    %cst_8 = arith.constant 1.000000e+00 : f32
    %15 = vector.broadcast %cst_7 : f32 to vector<36x16xf32>
    %16 = arith.maximumf %15, %14 : vector<36x16xf32>
    %17 = vector.broadcast %cst_8 : f32 to vector<36x16xf32>
    %18 = arith.minimumf %17, %16 : vector<36x16xf32>
    %c56_9 = arith.constant 56 : index
    %c118 = arith.constant 118 : index
    %19 = vector.load %arg2[%c56_9, %c118] : memref<80x128xf32, #tpu.memory_space<vmem>>, vector<16x2xf32>
    %cst_10 = arith.constant dense<0.000000e+00> : vector<36x2xf32>
    %20 = tpu.matmul %18, %19, %cst_10 {dimension_numbers = #tpu.dot_dimension_numbers<[1], [0], [0], [1], [0, 0, 1, 1], [], []>, precision = #tpu.contract_precision<fp32>} : vector<36x16xf32>, vector<16x2xf32>, vector<36x2xf32> -> vector<36x2xf32>
    %c40_11 = arith.constant 40 : index
    %c100 = arith.constant 100 : index
    %21 = vector.load %arg2[%c40_11, %c100] : memref<80x128xf32, #tpu.memory_space<vmem>>, vector<1x2xf32>
    %22 = vector.broadcast %21 : vector<1x2xf32> to vector<36x2xf32>
    %23 = arith.addf %20, %22 : vector<36x2xf32>
    %cst_12 = arith.constant -1.000000e+00 : f32
    %cst_13 = arith.constant 1.000000e+00 : f32
    %24 = vector.broadcast %cst_12 : f32 to vector<36x2xf32>
    %25 = arith.maximumf %24, %23 : vector<36x2xf32>
    %26 = vector.broadcast %cst_13 : f32 to vector<36x2xf32>
    %27 = arith.minimumf %26, %25 : vector<36x2xf32>
    %28 = vector.extract_strided_slice %27 {offsets = [0, 0], sizes = [36, 1], strides = [1, 1]} : vector<36x2xf32> to vector<36x1xf32>
    %c0_14 = arith.constant 0 : index
    %c34 = arith.constant 34 : index
    %29 = vector.load %arg2[%c0_14, %c34] : memref<80x128xf32, #tpu.memory_space<vmem>>, vector<36x34xf32>
    %cst_15 = arith.constant dense<0.000000e+00> : vector<1x34xf32>
    %30 = tpu.matmul %28, %29, %cst_15 {dimension_numbers = #tpu.dot_dimension_numbers<[0], [0], [1], [1], [0, 1, 1, 1], [], []>, precision = #tpu.contract_precision<fp32>} : vector<36x1xf32>, vector<36x34xf32>, vector<1x34xf32> -> vector<1x34xf32>
    %31 = vector.extract_strided_slice %27 {offsets = [0, 1], sizes = [36, 1], strides = [1, 1]} : vector<36x2xf32> to vector<36x1xf32>
    %c40_16 = arith.constant 40 : index
    %c34_17 = arith.constant 34 : index
    %32 = vector.load %arg2[%c40_16, %c34_17] : memref<80x128xf32, #tpu.memory_space<vmem>>, vector<36x34xf32>
    %cst_18 = arith.constant dense<0.000000e+00> : vector<1x34xf32>
    %33 = tpu.matmul %31, %32, %cst_18 {dimension_numbers = #tpu.dot_dimension_numbers<[0], [0], [1], [1], [0, 1, 1, 1], [], []>, precision = #tpu.contract_precision<fp32>} : vector<36x1xf32>, vector<36x34xf32>, vector<1x34xf32> -> vector<1x34xf32>
    %34 = arith.addf %30, %33 : vector<1x34xf32>
    %c0_19 = arith.constant 0 : index
    %35 = memref.load %arg1[%c0_19] : memref<1xf32, #tpu.memory_space<smem>>
    %c72 = arith.constant 72 : index
    %c0_20 = arith.constant 0 : index
    %36 = vector.load %arg2[%c72, %c0_20] : memref<80x128xf32, #tpu.memory_space<vmem>>, vector<1x34xf32>
    %37 = vector.broadcast %35 : f32 to vector<1x34xf32>
    %38 = arith.mulf %37, %36 : vector<1x34xf32>
    %39 = arith.addf %34, %38 : vector<1x34xf32>
    %c48 = arith.constant 48 : index
    %c68_21 = arith.constant 68 : index
    %40 = vector.load %arg2[%c48, %c68_21] : memref<80x128xf32, #tpu.memory_space<vmem>>, vector<1x34xf32>
    %41 = arith.addf %39, %40 : vector<1x34xf32>
    %cst_22 = arith.constant -1.000000e+00 : f32
    %cst_23 = arith.constant 1.000000e+00 : f32
    %42 = vector.broadcast %cst_22 : f32 to vector<1x34xf32>
    %43 = arith.maximumf %42, %41 : vector<1x34xf32>
    %44 = vector.broadcast %cst_23 : f32 to vector<1x34xf32>
    %45 = arith.minimumf %44, %43 : vector<1x34xf32>
    %c0_24 = arith.constant 0 : index
    %c68_25 = arith.constant 68 : index
    %46 = vector.load %arg2[%c0_24, %c68_25] : memref<80x128xf32, #tpu.memory_space<vmem>>, vector<34x34xf32>
    %cst_26 = arith.constant dense<0.000000e+00> : vector<1x34xf32>
    %47 = tpu.matmul %45, %46, %cst_26 {dimension_numbers = #tpu.dot_dimension_numbers<[1], [0], [0], [1], [0, 0, 1, 1], [], []>, precision = #tpu.contract_precision<fp32>} : vector<1x34xf32>, vector<34x34xf32>, vector<1x34xf32> -> vector<1x34xf32>
    %c56_27 = arith.constant 56 : index
    %c68_28 = arith.constant 68 : index
    %48 = vector.load %arg2[%c56_27, %c68_28] : memref<80x128xf32, #tpu.memory_space<vmem>>, vector<1x34xf32>
    %49 = arith.addf %47, %48 : vector<1x34xf32>
    %cst_29 = arith.constant -1.000000e+00 : f32
    %cst_30 = arith.constant 1.000000e+00 : f32
    %50 = vector.broadcast %cst_29 : f32 to vector<1x34xf32>
    %51 = arith.maximumf %50, %49 : vector<1x34xf32>
    %52 = vector.broadcast %cst_30 : f32 to vector<1x34xf32>
    %53 = arith.minimumf %52, %51 : vector<1x34xf32>
    %c0_31 = arith.constant 0 : index
    %c118_32 = arith.constant 118 : index
    %54 = vector.load %arg2[%c0_31, %c118_32] : memref<80x128xf32, #tpu.memory_space<vmem>>, vector<34x1xf32>
    %cst_33 = arith.constant dense<0.000000e+00> : vector<1x1xf32>
    %55 = tpu.matmul %53, %54, %cst_33 {dimension_numbers = #tpu.dot_dimension_numbers<[1], [0], [0], [1], [0, 0, 1, 1], [], []>, precision = #tpu.contract_precision<fp32>} : vector<1x34xf32>, vector<34x1xf32>, vector<1x1xf32> -> vector<1x1xf32>
    %c64 = arith.constant 64 : index
    %c68_34 = arith.constant 68 : index
    %56 = vector.load %arg2[%c64, %c68_34] : memref<80x128xf32, #tpu.memory_space<vmem>>, vector<1x1xf32>
    %57 = arith.addf %55, %56 : vector<1x1xf32>
    %cst_35 = arith.constant -1.000000e+00 : f32
    %cst_36 = arith.constant 1.000000e+00 : f32
    %58 = vector.broadcast %cst_35 : f32 to vector<1x1xf32>
    %59 = arith.maximumf %58, %57 : vector<1x1xf32>
    %60 = vector.broadcast %cst_36 : f32 to vector<1x1xf32>
    %61 = arith.minimumf %60, %59 : vector<1x1xf32>
    %c0_37 = arith.constant 0 : index
    %c0_38 = arith.constant 0 : index
    %62 = vector.load %arg3[%c0_37, %c0_38] : memref<1x1xf32, #tpu.memory_space<vmem>>, vector<1x1xf32>
    tpu.vector_store %arg3[%c0_37, %c0_38], %61 {strides = array<i32>} : memref<1x1xf32, #tpu.memory_space<vmem>>, vector<1x1xf32>,
    return
  }
}

</mosaic_0001>

<bundles_post_ra>
// kernel: lila_forward.1
= control target key start
LH: loop header
LB: loop body
LE: loop exit
PB: predicated region body
PF: predicated region fallthrough
CT: control target
= control target key end

     0   :  { %s2162_s16 = smov 26   ;;  %s2654_s0 = inlined_call_operand.vmem [shape: f32[36,54], index: 0, kind: input, shape index: {}]   ;;  %s2655_s1 = inlined_call_operand.<no memory space> [shape: f32[1], index: 1, kind: input, shape index: {}]   ;;  %s2656_s2 = inlined_call_operand.vmem [shape: f32[80,128], index: 2, kind: input, shape index: {}]   ;;  %s2657_s3 = inlined_call_operand.hbm [shape: f32[1,1], index: 3, kind: output, shape index: {}]  }
   0x1   :  { %v27_v0 = vld [vmem:[%s2656_s2 + $0x30] sm:$0x3f]  ;;  %v25_v1 = vld [vmem:[%s2656_s2 + $0x20] sm:$0xff] }
   0x2   :  { %49 = vrot.lane.b32.xlu0 %v27_v0, %s2162_s16  ;;  %45 = vrot.lane.b32.xlu1 %v25_v1, %s2162_s16  ;;  %v23_v2 = vld [vmem:[%s2656_s2 + $0x10] sm:$0xff] }
   0x3   :  { %41 = vrot.lane.b32.xlu2 %v23_v2, %s2162_s16 }
   0x4   :  { %9 = vsyncpa [#allocation4], 0  ;;  %v26_v3 = vld [vmem:[%s2656_s2 + $0x28] sm:$0xff]  ;;  %v24_v4 = vld [vmem:[%s2656_s2 + $0x18] sm:$0xff]  ;;  %vm61_vm0 = vcmask 441344   ;;  %vm77_vm1 = vcmask 1045504  }
   0x5   :  { %v22_v5 = vld [vmem:[%s2656_s2 + $0x8] sm:$0xff]  ;;  %v21_v6 = vld [vmem:[%s2656_s2] sm:$0xff]  ;;  %v2254_v24 = vld [vmem:[%s2656_s2 + $0x38] sm:$0xff]  ;;  %s2163_s8 = smov 60   ;;  %vm451_vm2 = vcmask 130048   ;;  %s2166_s18 = smov 28  }
   0x6   :  { %v16_v8 = vld [vmem:[%s2654_s0] sm:$0xff]  ;;  %v17_v17 = vld [vmem:[%s2654_s0 + $0x8] sm:$0xff]  ;;  %v18_v42 = vld [vmem:[%s2654_s0 + $0x10] sm:$0xff]  ;;  %s2167_s19 = smov 127   ;;  %s2168_s20 = smov 94   ;;  %vm1162_vm3 = vcmask 1043456  }
   0x7   :  { %v63_v9 = vsel %vm61_vm0, %v16_v8, 0  ;;  %v2249_v23 = vld [vmem:[%s2656_s2 + $0x28] ss:$0 sm:$0xff]  ;;  %v66_v28 = vsel %vm61_vm0, %v17_v17, 0  ;;  %v69_v49 = vsel %vm61_vm0, %v18_v42, 0  ;;  %v19_v63 = vld [vmem:[%s2654_s0 + $0x18] sm:$0xff] }
   0x8   :  { %v2224_v14 = vand.u32 4294901760, %v63_v9  ;;  %v2281_v38 = vand.u32 4294901760, %v66_v28  ;;  %v2317_v59 = vand.u32 4294901760, %v69_v49  ;;  %vm1158_vm4 = vcmask 293888   ;;  %s2099_s23 = sshll.u32 %s2657_s3, 4  ;;  %s2100_s23 = int_to_ptr.hbm [resolvable:$true] %s2099_s23 }
   0x9   :  { %vm1663_vm5 = vcmask 1041408   ;;  %vm1659_vm6 = vcmask 277504   ;;  %vm2090_vm7 = vcmask 0  }
   0xa   :  { %47 = vrot.lane.b32.xlu0 %v26_v3, %s2162_s16  ;;  %43 = vrot.lane.b32.xlu1 %v24_v4, %s2162_s16  ;;  %v2241_v21 = vsub.f32 %v63_v9, %v2224_v14  ;;  %v2300_v47 = vsub.f32 %v66_v28, %v2281_v38  ;;  %v120_v3 = vsub.f32 %v69_v49, %v2317_v59  ;;  %v72_v4 = vsel %vm61_vm0, %v19_v63, 0 }
   0xb   :  { %39 = vrot.lane.b32.xlu2 %v22_v5, %s2162_s16 }
   0xc   :  { %v105_v34 = vand.u32 4294901760, %v2241_v21  ;;  %v113_v58 = vand.u32 4294901760, %v2300_v47  ;;  %v121_v9 = vand.u32 4294901760, %v120_v3 }
   0xe   :  { %v106_v43 = vsub.f32 %v2241_v21, %v105_v34  ;;  %v114_v2 = vsub.f32 %v2300_v47, %v113_v58 }
  0x10   :  { %v107_v54 = vand.u32 4294901760, %v106_v43  ;;  %v115_v8 = vand.u32 4294901760, %v114_v2 }
  0x12   :  { %37 = vrot.lane.b32.xlu0 %v21_v6, %s2162_s16  ;;  %58 = vrot.lane.b32.xlu1 %v2249_v23, %s2163_s8  ;;  %v2337_v6 = vld [vmem:[%s2656_s2 + $0x40] sm:$0xff] }
  0x13   :  { %444 = vrot.lane.b32.xlu2 %v2337_v6, %s2162_s16 }
  0x1a   :  { %442 = vrot.lane.b32.xlu0 %v2254_v24, %s2162_s16  ;;  %s2165_s16 = smov 10  }
  0x1b   :  { %762 = vrot.lane.b32.xlu2 %v2337_v6, %s2165_s16 }
  0x22   :  { %760 = vrot.lane.b32.xlu0 %v2254_v24, %s2165_s16 }
  0x5d   :  { %v42_v7 = vpop.permute.xlu2 %41 }
  0x5e   :  { %v2236_v18 = vand.u32 4294901760, %v42_v7 }
  0x60   :  { %v2271_v32 = vsub.f32 %v42_v7, %v2236_v18 }
  0x62   :  { %v179_v44 = vand.u32 4294901760, %v2271_v32 }
  0x64   :  { %v180_v55 = vsub.f32 %v2271_v32, %v179_v44 }
  0x65   :  { %v40_v20 = vpop.permute.xlu2 %39 }
  0x66   :  { %v2266_v31 = vand.u32 4294901760, %v40_v20  ;;  %v181_v0 = vand.u32 4294901760, %v180_v55 }
  0x68   :  { %v2284_v39 = vsub.f32 %v40_v20, %v2266_v31 }
  0x6a   :  { %v185_v53 = vand.u32 4294901760, %v2284_v39 }
  0x6c   :  { %v186_v61 = vsub.f32 %v2284_v39, %v185_v53 }
  0x6e   :  { %v187_v5 = vand.u32 4294901760, %v186_v61 }
  0x74   :  { %v50_v10 = vpop.permute.xlu0 %49  ;;  %v46_v11 = vpop.permute.xlu1 %45 }
  0x75   :  { %v78_v12 = vsel %vm77_vm1, %v50_v10, 0  ;;  %v2226_v15 = vand.u32 4294901760, %v46_v11  ;;  %v127_v10 = vand.u32 4294901760, %v72_v4 }
  0x76   :  { %v2222_v13 = vand.u32 4294901760, %v78_v12 }
  0x77   :  { %v2244_v22 = vsub.f32 %v46_v11, %v2226_v15  ;;  %v20_v11 = vld [vmem:[%s2654_s0 + $0x20] sm:$0xf]  ;;  %s2164_s0 = smov 44  }
  0x78   :  { %v2229_v16 = vsub.f32 %v78_v12, %v2222_v13  ;;  %90 = vmatpush.msra.mxu0 %v2222_v13  ;;  %282 = vmatpush.msra.mxu3 %v2222_v13  ;;  %v122_v12 = vsub.f32 %v120_v3, %v121_v9  ;;  %v75_v17 = vsel %vm61_vm0, %v20_v11, 0 }
  0x79   :  { %v167_v37 = vand.u32 4294901760, %v2244_v22  ;;  %448 = vrot.lane.b32.xlu1 %v2249_v23, %s2164_s0 }
  0x7a   :  { %227 = vmatpush.msra.mxu2 %v2229_v16  ;;  %v155_v19 = vand.u32 4294901760, %v2229_v16 }
  0x7b   :  { %v168_v46 = vsub.f32 %v2244_v22, %v167_v37 }
  0x7c   :  { %v48_v25 = vpop.permute.xlu0 %47  ;;  %v44_v26 = vpop.permute.xlu1 %43  ;;  %v156_v27 = vsub.f32 %v2229_v16, %v155_v19  ;;  %v128_v16 = vsub.f32 %v72_v4, %v127_v10 }
  0x7d   :  { %v2262_v29 = vand.u32 4294901760, %v48_v25  ;;  %v2264_v30 = vand.u32 4294901760, %v44_v26  ;;  %v169_v57 = vand.u32 4294901760, %v168_v46 }
  0x7e   :  { %v157_v33 = vand.u32 4294901760, %v156_v27  ;;  %v129_v20 = vand.u32 4294901760, %v128_v16 }
  0x7f   :  { %v160_v35 = vsub.f32 %v48_v25, %v2262_v29  ;;  %v2276_v36 = vsub.f32 %v44_v26, %v2264_v30  ;;  %92 = vmatpush.msra.mxu0 %v2262_v29  ;;  %284 = vmatpush.msra.mxu3 %v2262_v29 }
  0x80   :  { %158 = vmatpush.msra.mxu1 %v157_v33 }
  0x81   :  { %94 = vmatpush.msra.mxu0 %v2226_v15  ;;  %230 = vmatpush.msra.mxu2 %v160_v35  ;;  %v161_v40 = vand.u32 4294901760, %v160_v35  ;;  %v173_v41 = vand.u32 4294901760, %v2276_v36 }
  0x82   :  { %286 = vmatpush.msra.mxu3 %v2226_v15  ;;  %766 = vrot.lane.b32.xlu1 %v2249_v23, %s2166_s18 }
  0x83   :  { %96 = vmatpush.msra.mxu0 %v2264_v30  ;;  %233 = vmatpush.msra.mxu2 %v2244_v22  ;;  %v162_v45 = vsub.f32 %v160_v35, %v161_v40  ;;  %v174_v52 = vsub.f32 %v2276_v36, %v173_v41 }
  0x84   :  { %288 = vmatpush.msra.mxu3 %v2264_v30  ;;  %v38_v48 = vpop.permute.xlu0 %37 }
  0x85   :  { %v2304_v50 = vand.u32 4294901760, %v38_v48  ;;  %98 = vmatpush.msra.mxu0 %v2236_v18  ;;  %236 = vmatpush.msra.mxu2 %v2276_v36  ;;  %v163_v51 = vand.u32 4294901760, %v162_v45  ;;  %v175_v60 = vand.u32 4294901760, %v174_v52  ;;  %v59_v45 = vpop.permute.xlu1 %58 }
  0x86   :  { %290 = vmatpush.msra.mxu3 %v2236_v18 }
  0x87   :  { %v190_v56 = vsub.f32 %v38_v48, %v2304_v50  ;;  %100 = vmatpush.msra.mxu0 %v2266_v31  ;;  %164 = vmatpush.msra.mxu1 %v163_v51 }
  0x88   :  { %239 = vmatpush.msra.mxu2 %v2271_v32  ;;  %292 = vmatpush.msra.mxu3 %v2266_v31 }
  0x89   :  { %102 = vmatpush.msra.mxu0 %v2304_v50  ;;  %170 = vmatpush.msra.mxu1 %v169_v57  ;;  %v191_v62 = vand.u32 4294901760, %v190_v56 }
  0x8a   :  { %242 = vmatpush.msra.mxu2 %v2284_v39  ;;  %294 = vmatpush.msra.mxu3 %v2304_v50 }
  0x8b   :  { %108 = vmatmul.f32.vlgmr.msra.gmra.mxu0 %v107_v54  ;;  %176 = vmatpush.msra.mxu1 %v175_v60  ;;  %v192_v1 = vsub.f32 %v190_v56, %v191_v62 }
  0x8c   :  { %338 = vmatpush.msrb.mxu0 %v155_v19  ;;  %245 = vmatpush.msra.mxu2 %v190_v56  ;;  %v123_v19 = vand.u32 4294901760, %v122_v12 }
  0x8d   :  { %182 = vmatpush.msra.mxu1 %v181_v0  ;;  %248 = vmatmul.f32.vlgmr.msra.gmra.mxu2 %v2241_v21  ;;  %v193_v7 = vand.u32 4294901760, %v192_v1  ;;  %v135_v21 = vand.u32 4294901760, %v75_v17 }
  0x8e   :  { %342 = vmatpush.msrb.mxu0 %v161_v40  ;;  %298 = vmatmul.f32.vlgmr.msra.gmra.mxu3 %v105_v34 }
  0x8f   :  { %188 = vmatpush.msra.mxu1 %v187_v5  ;;  %v136_v22 = vsub.f32 %v75_v17, %v135_v21 }
  0x90   :  { %346 = vmatpush.msrb.mxu0 %v167_v37 }
  0x91   :  { %194 = vmatpush.msra.mxu1 %v193_v7  ;;  %v137_v25 = vand.u32 4294901760, %v136_v22 }
  0x92   :  { %350 = vmatpush.msrb.mxu0 %v173_v41  ;;  %196 = vmatmul.f32.vlgmr.msra.gmra.mxu1 %v2224_v14 }
  0x93   :  { %116 = vmatmul.f32.gmra.mxu0 %v115_v8  ;;  %394 = vmatpush.msrb.mxu1 %v2222_v13  ;;  %v130_v13 = vsub.f32 %v128_v16, %v129_v20  ;;  %v138_v26 = vsub.f32 %v136_v22, %v137_v25 }
  0x94   :  { %354 = vmatpush.msrb.mxu0 %v179_v44 }
  0x95   :  { %396 = vmatpush.msrb.mxu1 %v2262_v29  ;;  %253 = vmatmul.f32.gmra.mxu2 %v2300_v47  ;;  %v139_v27 = vand.u32 4294901760, %v138_v26  ;;  %v443_v29 = vpop.permute.xlu0 %442 }
  0x96   :  { %358 = vmatpush.msrb.mxu0 %v185_v53  ;;  %304 = vmatmul.f32.gmra.mxu3 %v113_v58 }
  0x97   :  { %398 = vmatpush.msrb.mxu1 %v2226_v15  ;;  %v131_v15 = vand.u32 4294901760, %v130_v13 }
  0x98   :  { %362 = vmatpush.msrb.mxu0 %v191_v62 }
  0x99   :  { %400 = vmatpush.msrb.mxu1 %v2264_v30  ;;  %v483_v30 = vand.u32 4294901760, %v443_v29 }
  0x9a   :  { %200 = vmatmul.f32.gmra.mxu1 %v2281_v38 }
  0x9b   :  { %124 = vmatmul.f32.gmra.mxu0 %v123_v19  ;;  %402 = vmatpush.msrb.mxu1 %v2236_v18 }
  0x9d   :  { %404 = vmatpush.msrb.mxu1 %v2266_v31  ;;  %258 = vmatmul.f32.gmra.mxu2 %v120_v3  ;;  %v547_v31 = vsub.f32 %v443_v29, %v483_v30 }
  0x9e   :  { %310 = vmatmul.f32.gmra.mxu3 %v121_v9 }
  0x9f   :  { %406 = vmatpush.msrb.mxu1 %v2304_v50  ;;  %v548_v35 = vand.u32 4294901760, %v547_v31 }
  0xa1   :  { %v549_v36 = vsub.f32 %v547_v31, %v548_v35 }
  0xa2   :  { %204 = vmatmul.f32.gmra.mxu1 %v2317_v59 }
  0xa3   :  { %132 = vmatmul.f32.gmra.mxu0 %v131_v15  ;;  %v550_v37 = vand.u32 4294901760, %v549_v36 }
  0xa5   :  { %263 = vmatmul.f32.gmra.mxu2 %v128_v16 }
  0xa6   :  { %316 = vmatmul.f32.gmra.mxu3 %v129_v20 }
  0xaa   :  { %208 = vmatmul.f32.gmra.mxu1 %v127_v10 }
  0xab   :  { %140 = vmatmul.f32.gmra.mxu0 %v139_v27 }
  0xad   :  { %268 = vmatmul.f32.gmra.mxu2 %v136_v22 }
  0xae   :  { %322 = vmatmul.f32.gmra.mxu3 %v137_v25 }
  0xb2   :  { %212 = vmatmul.f32.gmra.mxu1 %v135_v21 }
  0xb3   :  { %364 = vmatmul.f32.vlgmr.msrb.gmra.mxu0 %v2224_v14 }
  0xba   :  { %408 = vmatmul.f32.vlgmr.msrb.gmra.mxu1 %v2224_v14  ;;  %v445_v14 = vpop.permute.xlu2 %444 }
  0xbb   :  { %368 = vmatmul.f32.gmra.mxu0 %v2281_v38  ;;  %v481_v18 = vand.u32 4294901760, %v445_v14 }
  0xbd   :  { %v541_v28 = vsub.f32 %v445_v14, %v481_v18  ;;  %482 = vmatpush.msrb.mxu2 %v481_v18  ;;  %634 = vmatpush.msra.mxu1 %v481_v18 }
  0xbf   :  { %589 = vmatpush.msra.mxu0 %v541_v28  ;;  %484 = vmatpush.msrb.mxu2 %v483_v30  ;;  %v542_v32 = vand.u32 4294901760, %v541_v28 }
  0xc0   :  { %636 = vmatpush.msra.mxu1 %v483_v30 }
  0xc1   :  { %592 = vmatpush.msra.mxu0 %v547_v31  ;;  %v543_v33 = vsub.f32 %v541_v28, %v542_v32  ;;  %685 = vmatpush.msra.mxu2 %v542_v32 }
  0xc2   :  { %412 = vmatmul.f32.gmra.mxu1 %v2281_v38 }
  0xc3   :  { %372 = vmatmul.f32.gmra.mxu0 %v2317_v59  ;;  %v544_v34 = vand.u32 4294901760, %v543_v33  ;;  %689 = vmatpush.msra.mxu2 %v548_v35 }
  0xc5   :  { %545 = vmatpush.msrb.mxu3 %v544_v34 }
  0xc7   :  { %551 = vmatpush.msrb.mxu3 %v550_v37 }
  0xc9   :  { %726 = vmatpush.msra.mxu3 %v481_v18 }
  0xca   :  { %416 = vmatmul.f32.gmra.mxu1 %v2317_v59 }
  0xcb   :  { %376 = vmatmul.f32.gmra.mxu0 %v127_v10  ;;  %728 = vmatpush.msra.mxu3 %v483_v30 }
  0xd2   :  { %420 = vmatmul.f32.gmra.mxu1 %v127_v10 }
  0xd3   :  { %380 = vmatmul.f32.gmra.mxu0 %v135_v21 }
  0xda   :  { %424 = vmatmul.f32.gmra.mxu1 %v135_v21 }
 0x108   :  { %v109_v38 = vpop.f32.mrf.mxu0 }
 0x109   :  { %v110_v48 = vadd.f32 %v109_v38, %v59_v45 }
 0x10f   :  { %v197_v39 = vpop.f32.mrf.mxu1 }
 0x110   :  { %v117_v40 = vpop.f32.mrf.mxu0  ;;  %v249_v46 = vpop.f32.mrf.mxu2  ;;  %v198_v51 = vadd.f32 %v197_v39, %v110_v48 }
 0x111   :  { %v299_v50 = vpop.f32.mrf.mxu3  ;;  %v118_v54 = vadd.f32 %v117_v40, %v59_v45 }
 0x112   :  { %v250_v55 = vadd.f32 %v249_v46, %v198_v51 }
 0x114   :  { %v300_v58 = vadd.f32 %v299_v50, %v250_v55 }
 0x117   :  { %v201_v41 = vpop.f32.mrf.mxu1 }
 0x118   :  { %v125_v42 = vpop.f32.mrf.mxu0  ;;  %v254_v52 = vpop.f32.mrf.mxu2  ;;  %v202_v59 = vadd.f32 %v201_v41, %v118_v54 }
 0x119   :  { %v305_v57 = vpop.f32.mrf.mxu3  ;;  %v126_v62 = vadd.f32 %v125_v42, %v59_v45 }
 0x11a   :  { %v255_v63 = vadd.f32 %v254_v52, %v202_v59 }
 0x11c   :  { %v306_v4 = vadd.f32 %v305_v57, %v255_v63 }
 0x11f   :  { %v205_v43 = vpop.f32.mrf.mxu1 }
 0x120   :  { %v133_v44 = vpop.f32.mrf.mxu0  ;;  %v259_v2 = vpop.f32.mrf.mxu2  ;;  %v206_v5 = vadd.f32 %v205_v43, %v126_v62 }
 0x121   :  { %v311_v8 = vpop.f32.mrf.mxu3  ;;  %v134_v16 = vadd.f32 %v133_v44, %v59_v45 }
 0x122   :  { %v260_v17 = vadd.f32 %v259_v2, %v206_v5 }
 0x124   :  { %v312_v25 = vadd.f32 %v311_v8, %v260_v17 }
 0x127   :  { %v209_v47 = vpop.f32.mrf.mxu1 }
 0x128   :  { %v141_v49 = vpop.f32.mrf.mxu0  ;;  %v264_v22 = vpop.f32.mrf.mxu2  ;;  %v210_v26 = vadd.f32 %v209_v47, %v134_v16 }
 0x129   :  { %v317_v29 = vpop.f32.mrf.mxu3  ;;  %v142_v32 = vadd.f32 %v141_v49, %v59_v45  ;;  %v761_v16 = vpop.permute.xlu0 %760 }
 0x12a   :  { %v265_v33 = vadd.f32 %v264_v22, %v210_v26 }
 0x12c   :  { %v318_v39 = vadd.f32 %v317_v29, %v265_v33 }
 0x12f   :  { %v213_v53 = vpop.f32.mrf.mxu1 }
 0x130   :  { %v365_v56 = vpop.f32.mrf.mxu0  ;;  %v214_v40 = vadd.f32 %v213_v53, %v142_v32  ;;  %v269_v42 = vpop.f32.mrf.mxu2 }
 0x131   :  { %v366_v60 = vadd.f32 %v365_v56, %v300_v58  ;;  %v323_v50 = vpop.f32.mrf.mxu3 }
 0x132   :  { %v270_v48 = vadd.f32 %v269_v42, %v214_v40 }
 0x134   :  { %v324_v53 = vadd.f32 %v323_v50, %v270_v48 }
 0x137   :  { %v409_v61 = vpop.f32.mrf.mxu1 }
 0x138   :  { %v369_v0 = vpop.f32.mrf.mxu0  ;;  %v410_v1 = vadd.f32 %v409_v61, %v366_v60 }
 0x139   :  { %v370_v10 = vadd.f32 %v369_v0, %v306_v4 }
 0x13a   :  { %v2108_v3 = vclamps-f32 %v410_v1, 1.0 }
 0x13c   :  { %v453_v7 = vsel %vm451_vm2, %v2108_v3, 0 }
 0x13d   :  { %v2372_v9 = vand.u32 4294901760, %v453_v7 }
 0x13f   :  { %v486_v11 = vsub.f32 %v453_v7, %v2372_v9  ;;  %v413_v12 = vpop.f32.mrf.mxu1  ;;  %553 = vmatmul.f32.vlgmr.msrb.gmra.mxu3 %v2372_v9 }
 0x140   :  { %v373_v19 = vpop.f32.mrf.mxu0  ;;  %v414_v20 = vadd.f32 %v413_v12, %v370_v10 }
 0x141   :  { %595 = vmatmul.f32.vlgmr.msra.gmra.mxu0 %v486_v11  ;;  %v487_v21 = vand.u32 4294901760, %v486_v11  ;;  %v374_v28 = vadd.f32 %v373_v19, %v312_v25  ;;  %v800_v19 = vand.u32 4294901760, %v761_v16 }
 0x142   :  { %v2109_v13 = vclamps-f32 %v414_v20, 1.0 }
 0x143   :  { %640 = vmatmul.f32.vlgmr.msra.gmra.mxu1 %v487_v21  ;;  %v488_v15 = vsub.f32 %v486_v11, %v487_v21  ;;  %v763_v11 = vpop.permute.xlu2 %762  ;;  %v864_v20 = vsub.f32 %v761_v16, %v800_v19 }
 0x144   :  { %v456_v27 = vsel %vm451_vm2, %v2109_v13, 0  ;;  %v798_v12 = vand.u32 4294901760, %v763_v11 }
 0x145   :  { %v2377_v14 = vand.u32 4294901760, %v456_v27  ;;  %v489_v18 = vand.u32 4294901760, %v488_v15  ;;  %v865_v13 = vand.u32 4294901760, %v864_v20 }
 0x146   :  { %v858_v17 = vsub.f32 %v763_v11, %v798_v12  ;;  %799 = vmatpush.msrb.mxu0 %v798_v12  ;;  %951 = vmatpush.msrb.mxu3 %v798_v12 }
 0x147   :  { %v417_v30 = vpop.f32.mrf.mxu1  ;;  %490 = vmatmul.f32.vlgmr.msrb.gmra.mxu2 %v489_v18  ;;  %557 = vmatmul.f32.gmra.mxu3 %v2377_v14  ;;  %v494_v31 = vsub.f32 %v456_v27, %v2377_v14  ;;  %v866_v23 = vsub.f32 %v864_v20, %v865_v13 }
 0x148   :  { %v418_v34 = vadd.f32 %v417_v30, %v374_v28  ;;  %v377_v35 = vpop.f32.mrf.mxu0  ;;  %906 = vmatpush.msrb.mxu2 %v858_v17  ;;  %801 = vmatpush.msrb.mxu0 %v800_v19  ;;  %v449_v30 = vpop.permute.xlu1 %448 }
 0x149   :  { %600 = vmatmul.f32.gmra.mxu0 %v494_v31  ;;  %v495_v36 = vand.u32 4294901760, %v494_v31  ;;  %v378_v46 = vadd.f32 %v377_v35, %v318_v39  ;;  %953 = vmatpush.msrb.mxu3 %v800_v19  ;;  %v867_v15 = vand.u32 4294901760, %v866_v23 }
 0x14a   :  { %v2110_v37 = vclamps-f32 %v418_v34, 1.0  ;;  %909 = vmatpush.msrb.mxu2 %v864_v20 }
 0x14b   :  { %646 = vmatmul.f32.gmra.mxu1 %v495_v36  ;;  %v496_v38 = vsub.f32 %v494_v31, %v495_v36 }
 0x14c   :  { %v459_v41 = vsel %vm451_vm2, %v2110_v37, 0 }
 0x14d   :  { %v501_v43 = vand.u32 4294901760, %v459_v41  ;;  %v497_v44 = vand.u32 4294901760, %v496_v38 }
 0x14f   :  { %v421_v47 = vpop.f32.mrf.mxu1  ;;  %498 = vmatmul.f32.gmra.mxu2 %v497_v44  ;;  %561 = vmatmul.f32.gmra.mxu3 %v501_v43  ;;  %v502_v45 = vsub.f32 %v459_v41, %v501_v43 }
 0x150   :  { %v422_v49 = vadd.f32 %v421_v47, %v378_v46  ;;  %v381_v54 = vpop.f32.mrf.mxu0 }
 0x151   :  { %605 = vmatmul.f32.gmra.mxu0 %v502_v45  ;;  %v503_v51 = vand.u32 4294901760, %v502_v45  ;;  %v382_v59 = vadd.f32 %v381_v54, %v324_v53 }
 0x152   :  { %v2111_v52 = vclamps-f32 %v422_v49, 1.0 }
 0x153   :  { %652 = vmatmul.f32.gmra.mxu1 %v503_v51  ;;  %v504_v55 = vsub.f32 %v502_v45, %v503_v51 }
 0x154   :  { %v462_v56 = vsel %vm451_vm2, %v2111_v52, 0 }
 0x155   :  { %v509_v57 = vand.u32 4294901760, %v462_v56  ;;  %v505_v58 = vand.u32 4294901760, %v504_v55 }
 0x157   :  { %v425_v60 = vpop.f32.mrf.mxu1  ;;  %506 = vmatmul.f32.gmra.mxu2 %v505_v58  ;;  %565 = vmatmul.f32.gmra.mxu3 %v509_v57  ;;  %v510_v61 = vsub.f32 %v462_v56, %v509_v57 }
 0x158   :  { %v426_v62 = vadd.f32 %v425_v60, %v382_v59 }
 0x159   :  { %610 = vmatmul.f32.gmra.mxu0 %v510_v61  ;;  %v511_v63 = vand.u32 4294901760, %v510_v61 }
 0x15a   :  { %v2112_v0 = vclamps-f32 %v426_v62, 1.0 }
 0x15b   :  { %658 = vmatmul.f32.gmra.mxu1 %v511_v63  ;;  %v512_v1 = vsub.f32 %v510_v61, %v511_v63 }
 0x15c   :  { %v465_v2 = vsel %vm451_vm2, %v2112_v0, 0 }
 0x15d   :  { %v517_v3 = vand.u32 4294901760, %v465_v2  ;;  %v513_v4 = vand.u32 4294901760, %v512_v1 }
 0x15f   :  { %514 = vmatmul.f32.gmra.mxu2 %v513_v4  ;;  %569 = vmatmul.f32.gmra.mxu3 %v517_v3  ;;  %v518_v5 = vsub.f32 %v465_v2, %v517_v3 }
 0x161   :  { %615 = vmatmul.f32.gmra.mxu0 %v518_v5  ;;  %v519_v7 = vand.u32 4294901760, %v518_v5 }
 0x163   :  { %664 = vmatmul.f32.gmra.mxu1 %v519_v7  ;;  %v520_v8 = vsub.f32 %v518_v5, %v519_v7 }
 0x165   :  { %v521_v10 = vand.u32 4294901760, %v520_v8 }
 0x167   :  { %522 = vmatmul.f32.gmra.mxu2 %v521_v10  ;;  %730 = vmatmul.f32.vlgmr.msra.gmra.mxu3 %v2372_v9 }
 0x16f   :  { %691 = vmatmul.f32.vlgmr.msra.gmra.mxu2 %v2372_v9  ;;  %734 = vmatmul.f32.gmra.mxu3 %v2377_v14  ;;  %v859_v9 = vand.u32 4294901760, %v858_v17 }
 0x171   :  { %v860_v21 = vsub.f32 %v858_v17, %v859_v9  ;;  %1002 = vmatpush.msra.mxu0 %v859_v9 }
 0x173   :  { %v861_v22 = vand.u32 4294901760, %v860_v21  ;;  %1006 = vmatpush.msra.mxu0 %v865_v13 }
 0x175   :  { %862 = vmatpush.msrb.mxu1 %v861_v22 }
 0x177   :  { %695 = vmatmul.f32.gmra.mxu2 %v2377_v14  ;;  %738 = vmatmul.f32.gmra.mxu3 %v501_v43 }
 0x178   :  { %868 = vmatpush.msrb.mxu1 %v867_v15 }
 0x17a   :  { %1043 = vmatpush.msra.mxu1 %v798_v12 }
 0x17c   :  { %1045 = vmatpush.msra.mxu1 %v800_v19 }
 0x17f   :  { %699 = vmatmul.f32.gmra.mxu2 %v501_v43  ;;  %742 = vmatmul.f32.gmra.mxu3 %v509_v57 }
 0x187   :  { %703 = vmatmul.f32.gmra.mxu2 %v509_v57  ;;  %746 = vmatmul.f32.gmra.mxu3 %v517_v3 }
 0x18f   :  { %707 = vmatmul.f32.gmra.mxu2 %v517_v3 }
 0x1be   :  { %v596_v33 = vpop.f32.mrf.mxu0 }
 0x1c0   :  { %v641_v35 = vpop.f32.mrf.mxu1 }
 0x1c2   :  { %v554_v25 = vpop.f32.mrf.mxu3 }
 0x1c6   :  { %v601_v41 = vpop.f32.mrf.mxu0 }
 0x1c8   :  { %v647_v44 = vpop.f32.mrf.mxu1 }
 0x1ca   :  { %v491_v26 = vpop.f32.mrf.mxu2  ;;  %v558_v27 = vpop.f32.mrf.mxu3 }
 0x1cb   :  { %v492_v34 = vadd.f32 %v491_v26, %v449_v30 }
 0x1cd   :  { %v555_v36 = vadd.f32 %v554_v25, %v492_v34 }
 0x1ce   :  { %v606_v52 = vpop.f32.mrf.mxu0 }
 0x1cf   :  { %v597_v40 = vadd.f32 %v596_v33, %v555_v36 }
 0x1d0   :  { %v653_v59 = vpop.f32.mrf.mxu1 }
 0x1d1   :  { %v642_v43 = vadd.f32 %v641_v35, %v597_v40 }
 0x1d2   :  { %v499_v14 = vpop.f32.mrf.mxu2  ;;  %v562_v18 = vpop.f32.mrf.mxu3 }
 0x1d3   :  { %v500_v39 = vadd.f32 %v499_v14, %v449_v30 }
 0x1d5   :  { %v559_v42 = vadd.f32 %v558_v27, %v500_v39 }
 0x1d6   :  { %v611_v8 = vpop.f32.mrf.mxu0 }
 0x1d7   :  { %v602_v49 = vadd.f32 %v601_v41, %v559_v42 }
 0x1d8   :  { %v659_v21 = vpop.f32.mrf.mxu1 }
 0x1d9   :  { %v648_v53 = vadd.f32 %v647_v44, %v602_v49 }
 0x1da   :  { %v507_v28 = vpop.f32.mrf.mxu2  ;;  %v566_v29 = vpop.f32.mrf.mxu3 }
 0x1db   :  { %v508_v45 = vadd.f32 %v507_v28, %v449_v30 }
 0x1dd   :  { %v563_v54 = vadd.f32 %v562_v18, %v508_v45 }
 0x1df   :  { %v607_v63 = vadd.f32 %v606_v52, %v563_v54 }
 0x1e1   :  { %v654_v7 = vadd.f32 %v653_v59, %v607_v63 }
 0x1e2   :  { %v515_v31 = vpop.f32.mrf.mxu2  ;;  %v570_v32 = vpop.f32.mrf.mxu3 }
 0x1e3   :  { %v516_v61 = vadd.f32 %v515_v31, %v449_v30  ;;  %v616_v31 = vpop.f32.mrf.mxu0 }
 0x1e5   :  { %v567_v4 = vadd.f32 %v566_v29, %v516_v61 }
 0x1e7   :  { %v612_v20 = vadd.f32 %v611_v8, %v567_v4 }
 0x1e9   :  { %v660_v26 = vadd.f32 %v659_v21, %v612_v20 }
 0x1ea   :  { %v523_v37 = vpop.f32.mrf.mxu2  ;;  %v731_v38 = vpop.f32.mrf.mxu3 }
 0x1eb   :  { %v524_v19 = vadd.f32 %v523_v37, %v449_v30  ;;  %v665_v37 = vpop.f32.mrf.mxu1 }
 0x1ed   :  { %v571_v15 = vadd.f32 %v570_v32, %v524_v19 }
 0x1ef   :  { %v617_v34 = vadd.f32 %v616_v31, %v571_v15 }
 0x1f1   :  { %v666_v39 = vadd.f32 %v665_v37, %v617_v34 }
 0x1f2   :  { %v692_v46 = vpop.f32.mrf.mxu2  ;;  %v735_v50 = vpop.f32.mrf.mxu3 }
 0x1f3   :  { %v693_v47 = vadd.f32 %v692_v46, %v642_v43 }
 0x1f5   :  { %v732_v48 = vadd.f32 %v731_v38, %v693_v47 }
 0x1f7   :  { %v2113_v51 = vclamps-f32 %v732_v48, 1.0 }
 0x1f9   :  { %v770_v55 = vsel %vm451_vm2, %v2113_v51, 0 }
 0x1fa   :  { %v2390_v56 = vand.u32 4294901760, %v770_v55  ;;  %v696_v57 = vpop.f32.mrf.mxu2  ;;  %v739_v2 = vpop.f32.mrf.mxu3 }
 0x1fb   :  { %v697_v58 = vadd.f32 %v696_v57, %v648_v53 }
 0x1fc   :  { %v803_v60 = vsub.f32 %v770_v55, %v2390_v56  ;;  %870 = vmatmul.f32.vlgmr.msrb.gmra.mxu1 %v2390_v56 }
 0x1fd   :  { %v736_v62 = vadd.f32 %v735_v50, %v697_v58 }
 0x1fe   :  { %912 = vmatmul.f32.vlgmr.msrb.gmra.mxu2 %v803_v60  ;;  %v804_v0 = vand.u32 4294901760, %v803_v60 }
 0x1ff   :  { %v2114_v1 = vclamps-f32 %v736_v62, 1.0 }
 0x200   :  { %957 = vmatmul.f32.vlgmr.msrb.gmra.mxu3 %v804_v0  ;;  %v805_v3 = vsub.f32 %v803_v60, %v804_v0 }
 0x201   :  { %v773_v5 = vsel %vm451_vm2, %v2114_v1, 0  ;;  %v767_v1 = vpop.permute.xlu1 %766 }
 0x202   :  { %v2395_v10 = vand.u32 4294901760, %v773_v5  ;;  %v700_v11 = vpop.f32.mrf.mxu2  ;;  %v806_v12 = vand.u32 4294901760, %v805_v3  ;;  %v743_v14 = vpop.f32.mrf.mxu3 }
 0x203   :  { %v701_v16 = vadd.f32 %v700_v11, %v654_v7 }
 0x204   :  { %807 = vmatmul.f32.vlgmr.msrb.gmra.mxu0 %v806_v12  ;;  %874 = vmatmul.f32.gmra.mxu1 %v2395_v10  ;;  %v811_v17 = vsub.f32 %v773_v5, %v2395_v10 }
 0x205   :  { %v740_v9 = vadd.f32 %v739_v2, %v701_v16 }
 0x206   :  { %917 = vmatmul.f32.gmra.mxu2 %v811_v17  ;;  %v812_v13 = vand.u32 4294901760, %v811_v17 }
 0x207   :  { %v2115_v22 = vclamps-f32 %v740_v9, 1.0 }
 0x208   :  { %963 = vmatmul.f32.gmra.mxu3 %v812_v13  ;;  %v813_v23 = vsub.f32 %v811_v17, %v812_v13 }
 0x209   :  { %v776_v25 = vsel %vm451_vm2, %v2115_v22, 0 }
 0x20a   :  { %v818_v27 = vand.u32 4294901760, %v776_v25  ;;  %v704_v18 = vpop.f32.mrf.mxu2  ;;  %v814_v28 = vand.u32 4294901760, %v813_v23  ;;  %v747_v44 = vpop.f32.mrf.mxu3 }
 0x20b   :  { %v705_v29 = vadd.f32 %v704_v18, %v660_v26 }
 0x20c   :  { %815 = vmatmul.f32.gmra.mxu0 %v814_v28  ;;  %878 = vmatmul.f32.gmra.mxu1 %v818_v27  ;;  %v819_v30 = vsub.f32 %v776_v25, %v818_v27 }
 0x20d   :  { %v744_v33 = vadd.f32 %v743_v14, %v705_v29 }
 0x20e   :  { %922 = vmatmul.f32.gmra.mxu2 %v819_v30  ;;  %v820_v35 = vand.u32 4294901760, %v819_v30 }
 0x20f   :  { %v2116_v36 = vclamps-f32 %v744_v33, 1.0 }
 0x210   :  { %969 = vmatmul.f32.gmra.mxu3 %v820_v35  ;;  %v821_v32 = vsub.f32 %v819_v30, %v820_v35 }
 0x211   :  { %v779_v38 = vsel %vm451_vm2, %v2116_v36, 0 }
 0x212   :  { %v826_v40 = vand.u32 4294901760, %v779_v38  ;;  %v708_v41 = vpop.f32.mrf.mxu2  ;;  %v822_v42 = vand.u32 4294901760, %v821_v32 }
 0x213   :  { %v709_v43 = vadd.f32 %v708_v41, %v666_v39 }
 0x214   :  { %823 = vmatmul.f32.gmra.mxu0 %v822_v42  ;;  %882 = vmatmul.f32.gmra.mxu1 %v826_v40  ;;  %v827_v46 = vsub.f32 %v779_v38, %v826_v40 }
 0x215   :  { %v748_v47 = vadd.f32 %v747_v44, %v709_v43 }
 0x216   :  { %927 = vmatmul.f32.gmra.mxu2 %v827_v46  ;;  %v828_v45 = vand.u32 4294901760, %v827_v46 }
 0x217   :  { %v2117_v48 = vclamps-f32 %v748_v47, 1.0 }
 0x218   :  { %975 = vmatmul.f32.gmra.mxu3 %v828_v45  ;;  %v829_v49 = vsub.f32 %v827_v46, %v828_v45 }
 0x219   :  { %v782_v50 = vsel %vm451_vm2, %v2117_v48, 0 }
 0x21a   :  { %v834_v51 = vand.u32 4294901760, %v782_v50  ;;  %v830_v52 = vand.u32 4294901760, %v829_v49 }
 0x21c   :  { %831 = vmatmul.f32.gmra.mxu0 %v830_v52  ;;  %886 = vmatmul.f32.gmra.mxu1 %v834_v51  ;;  %v835_v54 = vsub.f32 %v782_v50, %v834_v51 }
 0x21e   :  { %932 = vmatmul.f32.gmra.mxu2 %v835_v54  ;;  %v836_v55 = vand.u32 4294901760, %v835_v54 }
 0x220   :  { %981 = vmatmul.f32.gmra.mxu3 %v836_v55  ;;  %v837_v53 = vsub.f32 %v835_v54, %v836_v55  ;;  %v1086_v54 = vld [vmem:[%s2656_s2 + $0x48] sm:$0xf]  ;;  %v1081_v55 = vld [vmem:[%s2656_s2 + $0x20] sm:$0xf] }
 0x222   :  { %v838_v57 = vand.u32 4294901760, %v837_v53 }
 0x224   :  { %839 = vmatmul.f32.gmra.mxu0 %v838_v57  ;;  %1047 = vmatmul.f32.vlgmr.msra.gmra.mxu1 %v2390_v56 }
 0x22c   :  { %1008 = vmatmul.f32.vlgmr.msra.gmra.mxu0 %v2390_v56  ;;  %1051 = vmatmul.f32.gmra.mxu1 %v2395_v10 }
 0x234   :  { %1012 = vmatmul.f32.gmra.mxu0 %v2395_v10  ;;  %1055 = vmatmul.f32.gmra.mxu1 %v818_v27 }
 0x23c   :  { %1016 = vmatmul.f32.gmra.mxu0 %v818_v27  ;;  %1059 = vmatmul.f32.gmra.mxu1 %v826_v40 }
 0x244   :  { %1020 = vmatmul.f32.gmra.mxu0 %v826_v40  ;;  %1063 = vmatmul.f32.gmra.mxu1 %v834_v51 }
 0x24c   :  { %1024 = vmatmul.f32.gmra.mxu0 %v834_v51 }
 0x279   :  { %v871_v58 = vpop.f32.mrf.mxu1 }
 0x281   :  { %v808_v59 = vpop.f32.mrf.mxu0  ;;  %v875_v60 = vpop.f32.mrf.mxu1 }
 0x282   :  { %v913_v3 = vpop.f32.mrf.mxu2  ;;  %v809_v4 = vadd.f32 %v808_v59, %v767_v1 }
 0x283   :  { %v958_v5 = vpop.f32.mrf.mxu3 }
 0x284   :  { %v872_v7 = vadd.f32 %v871_v58, %v809_v4 }
 0x286   :  { %v914_v11 = vadd.f32 %v913_v3, %v872_v7 }
 0x288   :  { %v959_v17 = vadd.f32 %v958_v5, %v914_v11  ;;  %v2460_v11 = vld [vmem:[%s2656_s2] sm:$0xff] }
 0x289   :  { %v816_v61 = vpop.f32.mrf.mxu0  ;;  %v879_v62 = vpop.f32.mrf.mxu1 }
 0x28a   :  { %v817_v12 = vadd.f32 %v816_v61, %v767_v1  ;;  %v918_v16 = vpop.f32.mrf.mxu2 }
 0x28b   :  { %v964_v9 = vpop.f32.mrf.mxu3 }
 0x28c   :  { %v876_v19 = vadd.f32 %v875_v60, %v817_v12 }
 0x28e   :  { %v919_v13 = vadd.f32 %v918_v16, %v876_v19 }
 0x290   :  { %v965_v27 = vadd.f32 %v964_v9, %v919_v13 }
 0x291   :  { %v824_v63 = vpop.f32.mrf.mxu0  ;;  %v883_v0 = vpop.f32.mrf.mxu1 }
 0x292   :  { %v825_v22 = vadd.f32 %v824_v63, %v767_v1  ;;  %v923_v26 = vpop.f32.mrf.mxu2 }
 0x293   :  { %v970_v29 = vpop.f32.mrf.mxu3 }
 0x294   :  { %v880_v14 = vadd.f32 %v879_v62, %v825_v22  ;;  %v1083_v62 = vld [vmem:[%s2656_s2 + $0x30] sm:$0xff] }
 0x296   :  { %v924_v31 = vadd.f32 %v923_v26, %v880_v14 }
 0x298   :  { %v971_v36 = vadd.f32 %v970_v29, %v924_v31 }
 0x299   :  { %v832_v2 = vpop.f32.mrf.mxu0  ;;  %v887_v56 = vpop.f32.mrf.mxu1 }
 0x29a   :  { %v833_v30 = vadd.f32 %v832_v2, %v767_v1  ;;  %v928_v32 = vpop.f32.mrf.mxu2  ;;  %v2444_v2 = vld [vmem:[%s2656_s2 + $0x8] sm:$0xff] }
 0x29b   :  { %v976_v43 = vpop.f32.mrf.mxu3 }
 0x29c   :  { %v884_v37 = vadd.f32 %v883_v0, %v833_v30  ;;  %v2433_v0 = vld [vmem:[%s2656_s2 + $0x18] sm:$0xff] }
 0x29e   :  { %v929_v40 = vadd.f32 %v928_v32, %v884_v37 }
 0x2a0   :  { %v977_v46 = vadd.f32 %v976_v43, %v929_v40 }
 0x2a1   :  { %v840_v8 = vpop.f32.mrf.mxu0  ;;  %v1048_v10 = vpop.f32.mrf.mxu1 }
 0x2a2   :  { %v841_v41 = vadd.f32 %v840_v8, %v767_v1  ;;  %v933_v50 = vpop.f32.mrf.mxu2  ;;  %v1082_v1 = vld [vmem:[%s2656_s2 + $0x28] sm:$0xff] }
 0x2a3   :  { %v982_v57 = vpop.f32.mrf.mxu3 }
 0x2a4   :  { %v888_v47 = vadd.f32 %v887_v56, %v841_v41 }
 0x2a6   :  { %v934_v51 = vadd.f32 %v933_v50, %v888_v47 }
 0x2a8   :  { %v983_v58 = vadd.f32 %v982_v57, %v934_v51 }
 0x2a9   :  { %v1009_v20 = vpop.f32.mrf.mxu0  ;;  %v1052_v15 = vpop.f32.mrf.mxu1 }
 0x2aa   :  { %v1010_v21 = vadd.f32 %v1009_v20, %v959_v17 }
 0x2ac   :  { %v2406_v23 = vadd.f32 %v1048_v10, %v1010_v21 }
 0x2ae   :  { %v2118_v25 = vclamps-f32 %v2406_v23, 1.0 }
 0x2b0   :  { %1092 = vrot.lane.b32.xlu2 %v2118_v25, %s2167_s19 }
 0x2b1   :  { %v1013_v18 = vpop.f32.mrf.mxu0  ;;  %v1056_v35 = vpop.f32.mrf.mxu1 }
 0x2b2   :  { %v1014_v28 = vadd.f32 %v1013_v18, %v965_v27 }
 0x2b4   :  { %v1053_v33 = vadd.f32 %v1052_v15, %v1014_v28 }
 0x2b6   :  { %v2119_v34 = vclamps-f32 %v1053_v33, 1.0 }
 0x2b8   :  { %1094 = vrot.lane.b32.xlu0 %v2119_v34, %s2167_s19 }
 0x2b9   :  { %v1017_v38 = vpop.f32.mrf.mxu0  ;;  %v1060_v45 = vpop.f32.mrf.mxu1 }
 0x2ba   :  { %v1018_v39 = vadd.f32 %v1017_v38, %v971_v36 }
 0x2bc   :  { %v1057_v42 = vadd.f32 %v1056_v35, %v1018_v39 }
 0x2be   :  { %v2120_v44 = vclamps-f32 %v1057_v42, 1.0 }
 0x2c0   :  { %1096 = vrot.lane.b32.xlu1 %v2120_v44, %s2167_s19  ;;  %1148 = vrot.lane.b32.xlu0 %v2254_v24, %s2168_s20 }
 0x2c1   :  { %v1021_v48 = vpop.f32.mrf.mxu0  ;;  %v1064_v60 = vpop.f32.mrf.mxu1 }
 0x2c2   :  { %v1022_v49 = vadd.f32 %v1021_v48, %v977_v46 }
 0x2c4   :  { %v1061_v52 = vadd.f32 %v1060_v45, %v1022_v49 }
 0x2c6   :  { %v2121_v53 = vclamps-f32 %v1061_v52, 1.0 }
 0x2c8   :  { %1152 = vrot.lane.b32.xlu1 %v1086_v54, %s2168_s20  ;;  %1408 = vrot.lane.b32.xlu0 %v1081_v55, %s2168_s20  ;;  %v2553_v55 = vld [vmem:[%s2656_s2 + $0x20] sm:$0x3] }
 0x2c9   :  { %1098 = vrot.lane.b32.xlu2 %v2121_v53, %s2167_s19  ;;  %v1025_v24 = vpop.f32.mrf.mxu0 }
 0x2ca   :  { %v1026_v59 = vadd.f32 %v1025_v24, %v983_v58  ;;  %v1622_v24 = vld [vmem:[%s2656_s2 + $0x30] sm:$0x1] }
 0x2cc   :  { %v1065_v61 = vadd.f32 %v1064_v60, %v1026_v59 }
 0x2ce   :  { %v2122_v63 = vclamps-f32 %v1065_v61, 1.0 }
 0x2d0   :  { %1146 = vrot.lane.b32.xlu1 %v1083_v62, %s2168_s20  ;;  %1100 = vrot.lane.b32.xlu0 %v2122_v63, %s2167_s19 }
 0x2d1   :  { %1150 = vrot.lane.b32.xlu2 %v2337_v6, %s2168_s20  ;;  %v2451_v6 = vld [vmem:[%s2656_s2 + $0x10] sm:$0xff] }
 0x2d8   :  { %1406 = vrot.lane.b32.xlu1 %v2433_v0, %s2168_s20 }
 0x2d9   :  { %1144 = vrot.lane.b32.xlu2 %v1082_v1, %s2168_s20 }
 0x2e0   :  { %1402 = vrot.lane.b32.xlu1 %v2444_v2, %s2168_s20 }
 0x2e1   :  { %1404 = vrot.lane.b32.xlu2 %v2451_v6, %s2168_s20 }
 0x2e9   :  { %1400 = vrot.lane.b32.xlu2 %v2460_v11, %s2168_s20 }
 0x2f1   :  { %1649 = vrot.lane.b32.xlu2 %v2553_v55, %s2163_s8 }
 0x2f9   :  { %1624 = vrot.lane.b32.xlu2 %v1622_v24, %s2163_s8 }
 0x301   :  { %1647 = vrot.lane.b32.xlu2 %v2433_v0, %s2163_s8 }
 0x309   :  { %1645 = vrot.lane.b32.xlu2 %v2451_v6, %s2163_s8 }
 0x30a   :  { %v1093_v56 = vpop.permute.xlu2 %1092 }
 0x30b   :  { %1107 = vxpose.xlu0.b32.start [1/5] (short) (narrow) %v1093_v56, 8 }
 0x311   :  { %1643 = vrot.lane.b32.xlu2 %v2444_v2, %s2163_s8 }
 0x315   :  { %1363 = vxpose.xlu1.b32.start [1/5] (short) (narrow) %v2118_v25, 8 }
 0x319   :  { %1641 = vrot.lane.b32.xlu2 %v2460_v11, %s2163_s8 }
 0x31d   :  { %1364 = vxpose.xlu1.b32.cont [2/5] (short) (narrow) %v2119_v34, 8 }
 0x323   :  { %v1099_v3 = vpop.permute.xlu2 %1098 }
 0x325   :  { %1365 = vxpose.xlu1.b32.cont [3/5] (short) (narrow) %v2120_v44, 8 }
 0x32a   :  { %v1095_v4 = vpop.permute.xlu0 %1094 }
 0x32b   :  { %1108 = vxpose.xlu0.b32.cont [2/5] (short) (narrow) %v1095_v4, 8  ;;  %v1151_v5 = vpop.permute.xlu2 %1150 }
 0x32c   :  { %v2455_v10 = vand.u32 4294901760, %v1151_v5 }
 0x32d   :  { %1366 = vxpose.xlu1.b32.cont [4/5] (short) (narrow) %v2121_v53, 8 }
 0x32e   :  { %v2465_v16 = vsub.f32 %v1151_v5, %v2455_v10 }
 0x330   :  { %v1214_v25 = vand.u32 4294901760, %v2465_v16 }
 0x332   :  { %v1097_v7 = vpop.permute.xlu1 %1096  ;;  %v1149_v8 = vpop.permute.xlu0 %1148  ;;  %v1215_v29 = vsub.f32 %v2465_v16, %v1214_v25 }
 0x333   :  { %1109 = vxpose.xlu0.b32.cont [3/5] (short) (narrow) %v1097_v7, 8  ;;  %v2462_v12 = vand.u32 4294901760, %v1149_v8  ;;  %v1145_v17 = vpop.permute.xlu2 %1144 }
 0x334   :  { %v2469_v13 = vand.u32 4294901760, %v1145_v17  ;;  %v1216_v37 = vand.u32 4294901760, %v1215_v29 }
 0x335   :  { %1367 = vxpose.xlu1.b32.end [5/5] (short) (narrow) %v2122_v63, 8  ;;  %v2472_v22 = vsub.f32 %v1149_v8, %v2462_v12 }
 0x336   :  { %v2488_v14 = vsub.f32 %v1145_v17, %v2469_v13 }
 0x337   :  { %v1220_v18 = vand.u32 4294901760, %v2472_v22 }
 0x338   :  { %v1232_v35 = vand.u32 4294901760, %v2488_v14 }
 0x339   :  { %v1221_v32 = vsub.f32 %v2472_v22, %v1220_v18 }
 0x33a   :  { %v1153_v19 = vpop.permute.xlu1 %1152  ;;  %v1409_v9 = vpop.permute.xlu0 %1408  ;;  %v1233_v40 = vsub.f32 %v2488_v14, %v1232_v35 }
 0x33b   :  { %v1163_v20 = vsel %vm1162_vm3, %v1153_v19, 0  ;;  %v1417_v21 = vsel %vm1162_vm3, %v1409_v9, 0  ;;  %1110 = vxpose.xlu0.b32.cont [4/5] (short) (narrow) %v1099_v3, 8  ;;  %v1222_v41 = vand.u32 4294901760, %v1221_v32  ;;  %v1405_v48 = vpop.permute.xlu2 %1404 }
 0x33c   :  { %v2474_v23 = vand.u32 4294901760, %v1163_v20  ;;  %v2476_v15 = vand.u32 4294901760, %v1417_v21  ;;  %v1234_v46 = vand.u32 4294901760, %v1233_v40  ;;  %v2532_v49 = vand.u32 4294901760, %v1405_v48 }
 0x33e   :  { %v2480_v26 = vsub.f32 %v1163_v20, %v2474_v23  ;;  %v2483_v27 = vsub.f32 %v1417_v21, %v2476_v15  ;;  %1177 = vmatpush.msra.mxu2 %v2474_v23  ;;  %1539 = vmatpush.msrb.mxu1 %v2476_v15  ;;  %v2538_v52 = vsub.f32 %v1405_v48, %v2532_v49 }
 0x340   :  { %v1208_v28 = vand.u32 4294901760, %v2480_v26  ;;  %1179 = vmatpush.msra.mxu2 %v2455_v10  ;;  %1508 = vmatpush.msrb.mxu0 %v2483_v27  ;;  %v1462_v4 = vand.u32 4294901760, %v2483_v27  ;;  %v1474_v8 = vand.u32 4294901760, %v2538_v52 }
 0x342   :  { %v1209_v31 = vsub.f32 %v2480_v26, %v1208_v28  ;;  %v1147_v30 = vpop.permute.xlu1 %1146  ;;  %v1101_v33 = vpop.permute.xlu0 %1100  ;;  %1181 = vmatpush.msra.mxu2 %v2462_v12 }
 0x343   :  { %v2501_v34 = vand.u32 4294901760, %v1147_v30  ;;  %1111 = vxpose.xlu0.b32.end [5/5] (short) (narrow) %v1101_v33, 8  ;;  %v1401_v53 = vpop.permute.xlu2 %1400 }
 0x344   :  { %v1210_v36 = vand.u32 4294901760, %v1209_v31  ;;  %v2559_v57 = vand.u32 4294901760, %v1401_v53  ;;  %v1475_v31 = vsub.f32 %v2538_v52, %v1474_v8 }
 0x345   :  { %v2508_v38 = vsub.f32 %v1147_v30, %v2501_v34  ;;  %1183 = vmatpush.msra.mxu2 %v2501_v34 }
 0x346   :  { %1211 = vmatpush.msra.mxu3 %v1210_v36  ;;  %v2562_v58 = vsub.f32 %v1401_v53, %v2559_v57 }
 0x347   :  { %v1226_v39 = vand.u32 4294901760, %v2508_v38  ;;  %1185 = vmatpush.msra.mxu2 %v2469_v13 }
 0x348   :  { %1217 = vmatpush.msra.mxu3 %v1216_v37  ;;  %v1486_v29 = vand.u32 4294901760, %v2562_v58 }
 0x349   :  { %1254 = vmatpush.msrb.mxu2 %v2480_v26  ;;  %v1227_v42 = vsub.f32 %v2508_v38, %v1226_v39 }
 0x34a   :  { %1223 = vmatpush.msra.mxu3 %v1222_v41  ;;  %v1407_v43 = vpop.permute.xlu1 %1406  ;;  %v1487_v30 = vsub.f32 %v2562_v58, %v1486_v29 }
 0x34b   :  { %1257 = vmatpush.msrb.mxu2 %v2465_v16  ;;  %v1228_v44 = vand.u32 4294901760, %v1227_v42  ;;  %v2521_v47 = vand.u32 4294901760, %v1407_v43 }
 0x34c   :  { %v1488_v26 = vand.u32 4294901760, %v1487_v30 }
 0x34d   :  { %1260 = vmatpush.msrb.mxu2 %v2472_v22  ;;  %1229 = vmatpush.msra.mxu3 %v1228_v44  ;;  %v2525_v45 = vsub.f32 %v1407_v43, %v2521_v47  ;;  %v1650_v22 = vpop.permute.xlu2 %1649 }
 0x34e   :  { %1541 = vmatpush.msrb.mxu1 %v2521_v47 }
 0x34f   :  { %1263 = vmatpush.msrb.mxu2 %v2508_v38  ;;  %1235 = vmatpush.msra.mxu3 %v1234_v46  ;;  %v1468_v7 = vand.u32 4294901760, %v2525_v45 }
 0x350   :  { %1511 = vmatpush.msrb.mxu0 %v2525_v45  ;;  %1543 = vmatpush.msrb.mxu1 %v2532_v49 }
 0x351   :  { %1285 = vmatpush.msrb.mxu3 %v2474_v23  ;;  %1266 = vmatpush.msrb.mxu2 %v2488_v14  ;;  %v1469_v9 = vsub.f32 %v2525_v45, %v1468_v7 }
 0x352   :  { %v1403_v50 = vpop.permute.xlu1 %1402  ;;  %1514 = vmatpush.msrb.mxu0 %v2538_v52 }
 0x353   :  { %1287 = vmatpush.msrb.mxu3 %v2455_v10  ;;  %v2535_v51 = vand.u32 4294901760, %v1403_v50 }
 0x355   :  { %1289 = vmatpush.msrb.mxu3 %v2462_v12  ;;  %v2543_v54 = vsub.f32 %v1403_v50, %v2535_v51  ;;  %1545 = vmatpush.msrb.mxu1 %v2535_v51 }
 0x357   :  { %1291 = vmatpush.msrb.mxu3 %v2501_v34  ;;  %1517 = vmatpush.msrb.mxu0 %v2543_v54  ;;  %v1480_v20 = vand.u32 4294901760, %v2543_v54 }
 0x358   :  { %1547 = vmatpush.msrb.mxu1 %v2559_v57 }
 0x359   :  { %1293 = vmatpush.msrb.mxu3 %v2469_v13  ;;  %1520 = vmatpush.msrb.mxu0 %v2562_v58 }
 0x3b1   :  { %1873 = vrot.lane.b32.xlu0 %v2433_v0, %s2165_s16  ;;  %v1463_v0 = vsub.f32 %v2483_v27, %v1462_v4  ;;  %v1481_v27 = vsub.f32 %v2543_v54, %v1480_v20 }
 0x3b3   :  { %v1482_v33 = vand.u32 4294901760, %v1481_v27 }
 0x3b9   :  { %v1379_v59 = vpop.trf.xlu1 }
 0x3ba   :  { %v1415_v60 = vsel %vm1158_vm4, %v1379_v59, 0 }
 0x3bb   :  { %v2570_v61 = vand.u32 4294901760, %v1415_v60 }
 0x3bd   :  { %v1441_v62 = vsub.f32 %v1415_v60, %v2570_v61 }
 0x3bf   :  { %v1442_v63 = vand.u32 4294901760, %v1441_v62  ;;  %1523 = vmatmul.f32.vlgmr.msrb.gmra.mxu0 %v1441_v62 }
 0x3c1   :  { %1551 = vmatmul.f32.vlgmr.msrb.gmra.mxu1 %v1442_v63  ;;  %v1443_v16 = vsub.f32 %v1441_v62, %v1442_v63 }
 0x3c7   :  { %v1123_v1 = vpop.trf.xlu0 }
 0x3c8   :  { %v1160_v56 = vsel %vm1158_vm4, %v1123_v1, 0  ;;  %v1635_v1 = vld [vmem:[%s2656_s2 + $0x38] sm:$0x1] }
 0x3c9   :  { %v1186_v3 = vand.u32 4294901760, %v1160_v56  ;;  %1656 = vrot.lane.b32.xlu2 %v1635_v1, %s2163_s8 }
 0x3cb   :  { %v1187_v5 = vsub.f32 %v1160_v56, %v1186_v3  ;;  %1237 = vmatmul.f32.vlgmr.msra.gmra.mxu3 %v1186_v3 }
 0x3cc   :  { %1349 = vmatpush.msra.mxu3 %v2474_v23  ;;  %v1476_v23 = vand.u32 4294901760, %v1475_v31 }
 0x3cd   :  { %v1188_v17 = vand.u32 4294901760, %v1187_v5 }
 0x3ce   :  { %1351 = vmatpush.msra.mxu3 %v2455_v10  ;;  %v1464_v10 = vand.u32 4294901760, %v1463_v0 }
 0x3cf   :  { %v1189_v19 = vsub.f32 %v1187_v5, %v1188_v17 }
 0x3d0   :  { %1353 = vmatpush.msra.mxu3 %v2462_v12  ;;  %v1470_v12 = vand.u32 4294901760, %v1469_v9 }
 0x3d1   :  { %v1190_v21 = vand.u32 4294901760, %v1189_v19  ;;  %1875 = vrot.lane.b32.xlu2 %v2553_v55, %s2165_s16  ;;  %v1619_v55 = vstv %s2655_s1 }
 0x3d2   :  { %1355 = vmatpush.msra.mxu3 %v2501_v34  ;;  %v2620_v34 = vpop.permute.xlu2 %1624 }
 0x3d3   :  { %1191 = vmatmul.f32.vlgmr.msra.gmra.mxu2 %v1190_v21  ;;  %1297 = vmatmul.f32.vlgmr.msrb.gmra.mxu3 %v1188_v17 }
 0x3d4   :  { %1315 = vmatpush.msra.mxu2 %v1208_v28  ;;  %1357 = vmatpush.msra.mxu3 %v2469_v13  ;;  %v1444_v13 = vand.u32 4294901760, %v1443_v16 }
 0x3d6   :  { %1465 = vmatpush.msrb.mxu3 %v1464_v10  ;;  %1319 = vmatpush.msra.mxu2 %v1214_v25  ;;  %v1618_v10 = vld [vmem:[%s2656_s2 + $0x48] sm:$0x1] }
 0x3d7   :  { %v1620_v30 = vmul.f32 %v1619_v55, %v1618_v10 }
 0x3d8   :  { %1471 = vmatpush.msrb.mxu3 %v1470_v12  ;;  %1323 = vmatpush.msra.mxu2 %v1220_v18 }
 0x3d9   :  { %1871 = vrot.lane.b32.xlu2 %v2451_v6, %s2165_s16 }
 0x3da   :  { %1477 = vmatpush.msrb.mxu3 %v1476_v23  ;;  %1327 = vmatpush.msra.mxu2 %v1226_v39  ;;  %v1648_v36 = vpop.permute.xlu2 %1647 }
 0x3db   :  { %1269 = vmatmul.f32.vlgmr.msrb.gmra.mxu2 %v1187_v5  ;;  %1359 = vmatmul.f32.vlgmr.msra.gmra.mxu3 %v1186_v3  ;;  %v1679_v37 = vand.u32 4294901760, %v1648_v36 }
 0x3dc   :  { %1483 = vmatpush.msrb.mxu3 %v1482_v33  ;;  %1331 = vmatpush.msra.mxu2 %v1232_v35 }
 0x3dd   :  { %v1714_v32 = vsub.f32 %v1648_v36, %v1679_v37 }
 0x3de   :  { %1431 = vmatpush.msrb.mxu2 %v2476_v15  ;;  %1489 = vmatpush.msrb.mxu3 %v1488_v26 }
 0x3df   :  { %v1715_v44 = vand.u32 4294901760, %v1714_v32 }
 0x3e0   :  { %1603 = vmatpush.msra.mxu3 %v2476_v15  ;;  %1433 = vmatpush.msrb.mxu2 %v2521_v47  ;;  %v1664_v15 = vsel %vm1663_vm5, %v1650_v22, 0 }
 0x3e1   :  { %v1677_v25 = vand.u32 4294901760, %v1664_v15  ;;  %1869 = vrot.lane.b32.xlu2 %v2444_v2, %s2165_s16 }
 0x3e2   :  { %1605 = vmatpush.msra.mxu3 %v2521_v47  ;;  %1435 = vmatpush.msrb.mxu2 %v2532_v49  ;;  %v1646_v38 = vpop.permute.xlu2 %1645 }
 0x3e3   :  { %1333 = vmatmul.f32.vlgmr.msra.gmra.mxu2 %v1186_v3  ;;  %1491 = vmatmul.f32.vlgmr.msrb.gmra.mxu3 %v2570_v61  ;;  %v1708_v14 = vsub.f32 %v1664_v15, %v1677_v25  ;;  %v1681_v39 = vand.u32 4294901760, %v1646_v38 }
 0x3e4   :  { %1607 = vmatpush.msra.mxu3 %v2532_v49  ;;  %1437 = vmatpush.msrb.mxu2 %v2535_v51  ;;  %v1716_v49 = vsub.f32 %v1714_v32, %v1715_v44 }
 0x3e5   :  { %1678 = vmatpush.msra.mxu0 %v1677_v25  ;;  %v1709_v18 = vand.u32 4294901760, %v1708_v14  ;;  %v1720_v40 = vsub.f32 %v1646_v38, %v1681_v39 }
 0x3e6   :  { %1609 = vmatpush.msra.mxu3 %v2535_v51  ;;  %1439 = vmatpush.msrb.mxu2 %v2559_v57  ;;  %v1717_v51 = vand.u32 4294901760, %v1716_v49 }
 0x3e7   :  { %v1710_v28 = vsub.f32 %v1708_v14, %v1709_v18  ;;  %1680 = vmatpush.msra.mxu0 %v1679_v37  ;;  %v1721_v46 = vand.u32 4294901760, %v1720_v40 }
 0x3e8   :  { %1569 = vmatpush.msra.mxu2 %v1462_v4  ;;  %1611 = vmatpush.msra.mxu3 %v2559_v57 }
 0x3e9   :  { %v1711_v35 = vand.u32 4294901760, %v1710_v28  ;;  %1682 = vmatpush.msra.mxu0 %v1681_v39  ;;  %v1722_v52 = vsub.f32 %v1720_v40, %v1721_v46  ;;  %1867 = vrot.lane.b32.xlu2 %v2460_v11, %s2165_s16 }
 0x3ea   :  { %1573 = vmatpush.msra.mxu2 %v1468_v7  ;;  %1786 = vmatpush.msrb.mxu3 %v1677_v25  ;;  %v1644_v41 = vpop.permute.xlu2 %1643 }
 0x3eb   :  { %1445 = vmatmul.f32.vlgmr.msrb.gmra.mxu2 %v1444_v13  ;;  %1613 = vmatmul.f32.vlgmr.msra.gmra.mxu3 %v2570_v61  ;;  %v1683_v42 = vand.u32 4294901760, %v1644_v41  ;;  %v1723_v57 = vand.u32 4294901760, %v1722_v52 }
 0x3ec   :  { %1577 = vmatpush.msra.mxu2 %v1474_v8  ;;  %1712 = vmatpush.msra.mxu1 %v1711_v35 }
 0x3ed   :  { %1788 = vmatpush.msrb.mxu3 %v1679_v37  ;;  %v1726_v43 = vsub.f32 %v1644_v41, %v1683_v42  ;;  %1684 = vmatpush.msra.mxu0 %v1683_v42 }
 0x3ee   :  { %1581 = vmatpush.msra.mxu2 %v1480_v20  ;;  %1718 = vmatpush.msra.mxu1 %v1717_v51 }
 0x3ef   :  { %1790 = vmatpush.msrb.mxu3 %v1681_v39  ;;  %v1727_v47 = vand.u32 4294901760, %v1726_v43 }
 0x3f0   :  { %1585 = vmatpush.msra.mxu2 %v1486_v29  ;;  %1724 = vmatpush.msra.mxu1 %v1723_v57 }
 0x3f1   :  { %1792 = vmatpush.msrb.mxu3 %v1683_v42  ;;  %v1728_v54 = vsub.f32 %v1726_v43, %v1727_v47 }
 0x3f2   :  { %1755 = vmatpush.msrb.mxu2 %v1708_v14  ;;  %v1642_v45 = vpop.permute.xlu2 %1641 }
 0x3f3   :  { %1587 = vmatmul.f32.vlgmr.msra.gmra.mxu2 %v2570_v61  ;;  %v1685_v48 = vand.u32 4294901760, %v1642_v45  ;;  %v1729_v58 = vand.u32 4294901760, %v1728_v54 }
 0x3f4   :  { %1758 = vmatpush.msrb.mxu2 %v1714_v32 }
 0x3f5   :  { %v1732_v50 = vsub.f32 %v1642_v45, %v1685_v48  ;;  %1686 = vmatpush.msra.mxu0 %v1685_v48  ;;  %1794 = vmatpush.msrb.mxu3 %v1685_v48 }
 0x3f6   :  { %1761 = vmatpush.msrb.mxu2 %v1720_v40  ;;  %1730 = vmatpush.msra.mxu1 %v1729_v58 }
 0x3f7   :  { %1816 = vmatpush.msrb.mxu0 %v1709_v18  ;;  %v1733_v53 = vand.u32 4294901760, %v1732_v50 }
 0x3f8   :  { %1764 = vmatpush.msrb.mxu2 %v1726_v43 }
 0x3f9   :  { %1820 = vmatpush.msrb.mxu0 %v1715_v44  ;;  %v1734_v24 = vsub.f32 %v1732_v50, %v1733_v53 }
 0x3fa   :  { %1767 = vmatpush.msrb.mxu2 %v1732_v50 }
 0x3fb   :  { %1824 = vmatpush.msrb.mxu0 %v1721_v46  ;;  %v1735_v59 = vand.u32 4294901760, %v1734_v24 }
 0x3fd   :  { %1828 = vmatpush.msrb.mxu0 %v1727_v47  ;;  %1736 = vmatpush.msra.mxu1 %v1735_v59 }
 0x3ff   :  { %1850 = vmatpush.msrb.mxu1 %v1677_v25  ;;  %1832 = vmatpush.msrb.mxu0 %v1733_v53 }
 0x401   :  { %1852 = vmatpush.msrb.mxu1 %v1679_v37 }
 0x403   :  { %1854 = vmatpush.msrb.mxu1 %v1681_v39 }
 0x405   :  { %1856 = vmatpush.msrb.mxu1 %v1683_v42 }
 0x407   :  { %1858 = vmatpush.msrb.mxu1 %v1685_v48 }
 0x423   :  { %v1874_v28 = vpop.permute.xlu0 %1873 }
 0x424   :  { %v1903_v35 = vand.u32 4294901760, %v1874_v28 }
 0x426   :  { %v1938_v36 = vsub.f32 %v1874_v28, %v1903_v35 }
 0x428   :  { %v1939_v38 = vand.u32 4294901760, %v1938_v36 }
 0x42a   :  { %v1940_v41 = vsub.f32 %v1938_v36, %v1939_v38 }
 0x42c   :  { %v1941_v47 = vand.u32 4294901760, %v1940_v41 }
 0x43c   :  { %v1524_v21 = vpop.f32.mrf.mxu0 }
 0x43e   :  { %v1552_v31 = vpop.f32.mrf.mxu1 }
 0x44e   :  { %v1238_v60 = vpop.f32.mrf.mxu3 }
 0x456   :  { %v1192_v61 = vpop.f32.mrf.mxu2  ;;  %v1298_v62 = vpop.f32.mrf.mxu3 }
 0x457   :  { %v1239_v56 = vadd.f32 %v1238_v60, %v1192_v61 }
 0x45e   :  { %v1270_v63 = vpop.f32.mrf.mxu2  ;;  %v1360_v4 = vpop.f32.mrf.mxu3 }
 0x45f   :  { %v1271_v3 = vadd.f32 %v1270_v63, %v1239_v56 }
 0x461   :  { %v1299_v7 = vadd.f32 %v1298_v62, %v1271_v3 }
 0x466   :  { %v1334_v5 = vpop.f32.mrf.mxu2  ;;  %v1492_v0 = vpop.f32.mrf.mxu3 }
 0x467   :  { %v1335_v8 = vadd.f32 %v1334_v5, %v1299_v7 }
 0x469   :  { %v1361_v17 = vadd.f32 %v1360_v4, %v1335_v8  ;;  %v1866_v4 = vld [vmem:[%s2656_s2 + $0x40] sm:$0x1]  ;;  %s2169_s2 = smov [#allocation3]  }
 0x46a   :  { %1882 = vrot.lane.b32.xlu1 %v1866_v4, %s2163_s8  ;;  %s2097_s8 = sshll.u32 %s2169_s2, 4  ;;  %s2098_s8 = int_to_ptr.vmem [resolvable:$true] %s2097_s8 }
 0x46e   :  { %v1446_v19 = vpop.f32.mrf.mxu2  ;;  %v1614_v6 = vpop.f32.mrf.mxu3 }
 0x46f   :  { %v1447_v9 = vadd.f32 %v1446_v19, %v1361_v17 }
 0x471   :  { %v1493_v20 = vadd.f32 %v1492_v0, %v1447_v9 }
 0x473   :  { %v1525_v29 = vadd.f32 %v1524_v21, %v1493_v20 }
 0x475   :  { %v1553_v12 = vadd.f32 %v1552_v31, %v1525_v29 }
 0x476   :  { %v1588_v23 = vpop.f32.mrf.mxu2 }
 0x477   :  { %v1589_v27 = vadd.f32 %v1588_v23, %v1553_v12 }
 0x479   :  { %v1615_v33 = vadd.f32 %v1614_v6, %v1589_v27 }
 0x47b   :  { %v1621_v26 = vadd.f32 %v1620_v30, %v1615_v33 }
 0x47d   :  { %v1627_v16 = vadd.f32 %v2620_v34, %v1621_v26  ;;  %v2642_v34 = vpop.permute.xlu2 %1656 }
 0x47f   :  { %v2123_v13 = vclamps-f32 %v1627_v16, 1.0 }
 0x481   :  { %v1661_v22 = vsel %vm1659_vm6, %v2123_v13, 0 }
 0x482   :  { %v1687_v15 = vand.u32 4294901760, %v1661_v22 }
 0x484   :  { %v1688_v25 = vsub.f32 %v1661_v22, %v1687_v15  ;;  %1738 = vmatmul.f32.vlgmr.msra.gmra.mxu1 %v1687_v15 }
 0x485   :  { %v1876_v37 = vpop.permute.xlu2 %1875 }
 0x486   :  { %1770 = vmatmul.f32.vlgmr.msrb.gmra.mxu2 %v1688_v25  ;;  %v1689_v14 = vand.u32 4294901760, %v1688_v25  ;;  %v1888_v11 = vsel %vm1663_vm5, %v1876_v37, 0 }
 0x487   :  { %v1901_v32 = vand.u32 4294901760, %v1888_v11 }
 0x488   :  { %1798 = vmatmul.f32.vlgmr.msrb.gmra.mxu3 %v1689_v14  ;;  %v1690_v18 = vsub.f32 %v1688_v25, %v1689_v14 }
 0x489   :  { %v1932_v39 = vsub.f32 %v1888_v11, %v1901_v32  ;;  %1902 = vmatpush.msra.mxu2 %v1901_v32  ;;  %2010 = vmatpush.msra.mxu1 %v1901_v32 }
 0x48a   :  { %v1691_v2 = vand.u32 4294901760, %v1690_v18 }
 0x48b   :  { %v1933_v40 = vand.u32 4294901760, %v1932_v39  ;;  %1904 = vmatpush.msra.mxu2 %v1903_v35  ;;  %2012 = vmatpush.msra.mxu1 %v1903_v35 }
 0x48c   :  { %1692 = vmatmul.f32.vlgmr.msra.gmra.mxu0 %v1691_v2  ;;  %1860 = vmatmul.f32.vlgmr.msrb.gmra.mxu1 %v1687_v15 }
 0x48d   :  { %1979 = vmatpush.msra.mxu0 %v1932_v39  ;;  %v1934_v42 = vsub.f32 %v1932_v39, %v1933_v40  ;;  %v1872_v43 = vpop.permute.xlu2 %1871 }
 0x48e   :  { %v1905_v44 = vand.u32 4294901760, %v1872_v43 }
 0x48f   :  { %1982 = vmatpush.msra.mxu0 %v1938_v36  ;;  %v1935_v46 = vand.u32 4294901760, %v1934_v42 }
 0x490   :  { %v1944_v45 = vsub.f32 %v1872_v43, %v1905_v44  ;;  %1906 = vmatpush.msra.mxu2 %v1905_v44  ;;  %2014 = vmatpush.msra.mxu1 %v1905_v44 }
 0x491   :  { %1936 = vmatpush.msra.mxu3 %v1935_v46 }
 0x492   :  { %v1945_v48 = vand.u32 4294901760, %v1944_v45  ;;  %1985 = vmatpush.msra.mxu0 %v1944_v45 }
 0x493   :  { %1942 = vmatpush.msra.mxu3 %v1941_v47 }
 0x494   :  { %1834 = vmatmul.f32.vlgmr.msrb.gmra.mxu0 %v1687_v15  ;;  %v1946_v49 = vsub.f32 %v1944_v45, %v1945_v48 }
 0x495   :  { %v1870_v50 = vpop.permute.xlu2 %1869 }
 0x496   :  { %v1907_v51 = vand.u32 4294901760, %v1870_v50  ;;  %v1947_v52 = vand.u32 4294901760, %v1946_v49 }
 0x498   :  { %v1950_v54 = vsub.f32 %v1870_v50, %v1907_v51  ;;  %1948 = vmatpush.msra.mxu3 %v1947_v52  ;;  %1908 = vmatpush.msra.mxu2 %v1907_v51 }
 0x499   :  { %2016 = vmatpush.msra.mxu1 %v1907_v51 }
 0x49a   :  { %1988 = vmatpush.msra.mxu0 %v1950_v54  ;;  %v1951_v57 = vand.u32 4294901760, %v1950_v54 }
 0x49c   :  { %v1952_v60 = vsub.f32 %v1950_v54, %v1951_v57 }
 0x49d   :  { %v1868_v53 = vpop.permute.xlu2 %1867 }
 0x49e   :  { %v1909_v58 = vand.u32 4294901760, %v1868_v53  ;;  %v1953_v61 = vand.u32 4294901760, %v1952_v60 }
 0x4a0   :  { %v1956_v24 = vsub.f32 %v1868_v53, %v1909_v58  ;;  %1910 = vmatpush.msra.mxu2 %v1909_v58  ;;  %2018 = vmatpush.msra.mxu1 %v1909_v58 }
 0x4a1   :  { %1954 = vmatpush.msra.mxu3 %v1953_v61 }
 0x4a2   :  { %2040 = vmatpush.msrb.mxu2 %v1933_v40  ;;  %v1957_v59 = vand.u32 4294901760, %v1956_v24  ;;  %1991 = vmatpush.msra.mxu0 %v1956_v24 }
 0x4a4   :  { %2044 = vmatpush.msrb.mxu2 %v1939_v38  ;;  %v1958_v62 = vsub.f32 %v1956_v24, %v1957_v59 }
 0x4a6   :  { %2048 = vmatpush.msrb.mxu2 %v1945_v48  ;;  %v1959_v63 = vand.u32 4294901760, %v1958_v62 }
 0x4a8   :  { %2052 = vmatpush.msrb.mxu2 %v1951_v57  ;;  %1960 = vmatpush.msra.mxu3 %v1959_v63 }
 0x4aa   :  { %2074 = vmatpush.msrb.mxu3 %v1901_v32  ;;  %2056 = vmatpush.msrb.mxu2 %v1957_v59 }
 0x4ac   :  { %2076 = vmatpush.msrb.mxu3 %v1903_v35 }
 0x4ae   :  { %2078 = vmatpush.msrb.mxu3 %v1905_v44 }
 0x4b0   :  { %2080 = vmatpush.msrb.mxu3 %v1907_v51 }
 0x4b2   :  { %2082 = vmatpush.msrb.mxu3 %v1909_v58 }
 0x4dc   :  { %v1883_v30 = vpop.permute.xlu1 %1882 }
 0x501   :  { %v1739_v1 = vpop.f32.mrf.mxu1 }
 0x509   :  { %v1693_v56 = vpop.f32.mrf.mxu0  ;;  %v1771_v7 = vpop.f32.mrf.mxu2 }
 0x50a   :  { %v1694_v3 = vadd.f32 %v1693_v56, %v2642_v34  ;;  %v1861_v20 = vpop.f32.mrf.mxu1 }
 0x50b   :  { %v1799_v17 = vpop.f32.mrf.mxu3 }
 0x50c   :  { %v1740_v5 = vadd.f32 %v1739_v1, %v1694_v3 }
 0x50e   :  { %v1772_v8 = vadd.f32 %v1771_v7, %v1740_v5 }
 0x510   :  { %v1800_v0 = vadd.f32 %v1799_v17, %v1772_v8 }
 0x511   :  { %v1835_v19 = vpop.f32.mrf.mxu0 }
 0x512   :  { %v1836_v9 = vadd.f32 %v1835_v19, %v1800_v0 }
 0x514   :  { %v1862_v21 = vadd.f32 %v1861_v20, %v1836_v9 }
 0x516   :  { %v2124_v29 = vclamps-f32 %v1862_v21, 1.0 }
 0x518   :  { %v1886_v31 = vsel %vm1659_vm6, %v2124_v29, 0 }
 0x519   :  { %v1911_v10 = vand.u32 4294901760, %v1886_v31 }
 0x51b   :  { %v1912_v55 = vsub.f32 %v1886_v31, %v1911_v10  ;;  %1962 = vmatmul.f32.vlgmr.msra.gmra.mxu3 %v1911_v10 }
 0x51d   :  { %v1913_v12 = vand.u32 4294901760, %v1912_v55  ;;  %1994 = vmatmul.f32.vlgmr.msra.gmra.mxu0 %v1912_v55 }
 0x51f   :  { %v1914_v23 = vsub.f32 %v1912_v55, %v1913_v12  ;;  %2022 = vmatmul.f32.vlgmr.msra.gmra.mxu1 %v1913_v12 }
 0x521   :  { %v1915_v27 = vand.u32 4294901760, %v1914_v23 }
 0x523   :  { %1916 = vmatmul.f32.vlgmr.msra.gmra.mxu2 %v1915_v27  ;;  %2084 = vmatmul.f32.vlgmr.msrb.gmra.mxu3 %v1911_v10 }
 0x52b   :  { %2058 = vmatmul.f32.vlgmr.msrb.gmra.mxu2 %v1911_v10 }
 0x59a   :  { %v1995_v13 = vpop.f32.mrf.mxu0 }
 0x59c   :  { %v2023_v15 = vpop.f32.mrf.mxu1 }
 0x59e   :  { %v1963_v6 = vpop.f32.mrf.mxu3 }
 0x5a6   :  { %v1917_v33 = vpop.f32.mrf.mxu2  ;;  %v2085_v2 = vpop.f32.mrf.mxu3 }
 0x5a7   :  { %v1918_v26 = vadd.f32 %v1917_v33, %v1883_v30 }
 0x5a9   :  { %v1964_v16 = vadd.f32 %v1963_v6, %v1918_v26 }
 0x5ab   :  { %v1996_v22 = vadd.f32 %v1995_v13, %v1964_v16 }
 0x5ad   :  { %v2024_v25 = vadd.f32 %v2023_v15, %v1996_v22 }
 0x5ae   :  { %v2059_v14 = vpop.f32.mrf.mxu2 }
 0x5af   :  { %v2060_v18 = vadd.f32 %v2059_v14, %v2024_v25 }
 0x5b1   :  { %v2086_v28 = vadd.f32 %v2085_v2, %v2060_v18 }
 0x5b3   :  { %v2125_v34 = vclamps-f32 %v2086_v28, 1.0 }
 0x5b5   :  { %2091 = vst.msk [vmem:[#allocation3] sm:$0x1] %vm2090_vm7, %v2125_v34 }
 0x5b6   :  { %2102 = dma.vmem_to_hbm [thread:$0]  %s2098_s8, 16, %s2100_s23, [#allocation4]  }
 0x5b7   :  { %2160 = dma.done.wait [#allocation4], 16  }
 0x5b8   :  { %2161 = vsyncadd [#allocation4], 4294967280 }
 0x5b9   :  { %2107 = vsyncpa [#allocation4], 1 }

</bundles_post_ra>
